<compile_context>
chip_gen: v7x
topology: tpu7x:2x2x1
jax: 0.10.0
libtpu: 0.0.40
codegen_flags: <defaults>
</compile_context>

<pallas_src>
import jax
import jax.numpy as jnp
import numpy as np
from jax.experimental import pallas as pl
from jax.experimental.pallas import tpu as pltpu

# ----- Synthetic stand-ins for ENCODING_CONSTANTS (small shapes) -----
MAX_MOVES = 4
MAX_PKM_PER_TEAM = 2
MOVE = 8                   # raw features per move
EMBEDDED_MOVE = 8          # embedded features per move
N_MOVES = MAX_MOVES * MAX_PKM_PER_TEAM + MAX_PKM_PER_TEAM   # = 10
FIELD_DIM = 16
STATE = FIELD_DIM + MOVE * N_MOVES                           # = 96
EMB_TOTAL = N_MOVES * EMBEDDED_MOVE                          # = 80
HL1, HL2 = 256, 128
ACTION_DIM = 64

LANE = 128                 # lane-dense width for inputs / outputs
TILE_B = 128               # max batch tile per grid step
BATCH = 200                # example batch (non-multiple of TILE_B on purpose)


def dqn_kernel(xin_ref, mask_ref, we_ref, be_ref, w1_ref, b1_ref,
               w2_ref, b2_ref, wh_ref, bh_ref, wf_ref, bf_ref, q_ref):
    xin = xin_ref[...]                                         # [TB, 128]  (field|moves|pad)

    # MoveEmbedder as one block-diagonal matmul whose output already sits in
    # the fc1-input layout (lanes 16..95); padded lanes stay exactly 0.
    emb = jnp.maximum(
        jnp.dot(xin, we_ref[...], preferred_element_type=jnp.float32)
        + be_ref[...], 0.0)                                    # [TB, 128]

    # Re-insert the (un-ReLU'd) field lanes via a masked add -> fc1 input.
    fused = emb + xin * mask_ref[...]                          # [TB, 128]

    # fc1
    h = jnp.maximum(
        jnp.dot(fused, w1_ref[...], preferred_element_type=jnp.float32)
        + b1_ref[...], 0.0)                                    # [TB, 256]

    # fc2
    h = jnp.maximum(
        jnp.dot(h, w2_ref[...], preferred_element_type=jnp.float32)
        + b2_ref[...], 0.0)                                    # [TB, 128]

    # Dueling first layers fused: heads[:, :128] = v, heads[:, 128:] = a
    heads = jnp.maximum(
        jnp.dot(h, wh_ref[...], preferred_element_type=jnp.float32)
        + bh_ref[...], 0.0)                                    # [TB, 256]

    # Final projection with the dueling combine folded into the weights:
    #   lanes 0..63 = Q = V + A - mean(A), lanes 64..127 = 0.
    # Lane-dense [TB, 128] store; lanes >= ACTION_DIM are sliced off outside.
    q_ref[...] = (jnp.dot(heads, wf_ref[...], preferred_element_type=jnp.float32)
                  + bf_ref[...])


def make_params(key):
    ks = jax.random.split(key, 12)
    scale = 0.05

    def w(k, shape):
        return (scale * jax.random.normal(k, shape)).astype(jnp.float32)

    p = {}
    # MoveEmbedder linear: [MOVE, EMBEDDED_MOVE]
    p["we"] = w(ks[0], (MOVE, EMBEDDED_MOVE))
    p["be"] = w(ks[1], (EMBEDDED_MOVE,))
    # fc1: in = FIELD_DIM + N_MOVES*EMBEDDED_MOVE, out = HL1 (stored [in, out])
    p["w1"] = w(ks[2], (FIELD_DIM + EMB_TOTAL, HL1))
    p["b1"] = w(ks[3], (HL1,))
    p["w2"] = w(ks[4], (HL1, HL2))
    p["b2"] = w(ks[5], (HL2,))
    p["wv1"] = w(ks[6], (HL2, HL2))
    p["bv1"] = w(ks[7], (HL2,))
    p["wv"] = w(ks[8], (HL2, 1))
    p["bv"] = jnp.zeros((1,), jnp.float32)
    p["wa1"] = w(ks[9], (HL2, HL2))
    p["ba1"] = w(ks[10], (HL2,))
    p["wa"] = w(ks[11], (HL2, ACTION_DIM))
    p["ba"] = jnp.zeros((ACTION_DIM,), jnp.float32)
    return p


def prepare_fused_params(p):
    """One-time weight fusion / padding (hoisted out of the per-call path)."""
    f32 = jnp.float32

    # Block-diagonal embedder placed so its output lands at lanes 16..95
    # (same lanes the raw moves occupy in xin).
    we_blk = jnp.kron(jnp.eye(N_MOVES, dtype=f32), p["we"])            # [80, 80]
    we_ext = jnp.zeros((LANE, LANE), f32)
    we_ext = we_ext.at[FIELD_DIM:FIELD_DIM + N_MOVES * MOVE,
                       FIELD_DIM:FIELD_DIM + EMB_TOTAL].set(we_blk)
    be_ext = jnp.zeros((1, LANE), f32)
    be_ext = be_ext.at[0, FIELD_DIM:FIELD_DIM + EMB_TOTAL].set(
        jnp.tile(p["be"], N_MOVES))

    # Mask selecting the field lanes of xin (lanes 0..15).
    field_mask = (jnp.arange(LANE) < FIELD_DIM).astype(f32).reshape(1, LANE)

    # fc1 weight padded to 128 rows (rows 96..127 are zero).
    w1p = jnp.zeros((LANE, HL1), f32).at[:FIELD_DIM + EMB_TOTAL, :].set(p["w1"])
    b1 = p["b1"].reshape(1, HL1)

    w2 = p["w2"]
    b2 = p["b2"].reshape(1, HL2)

    # Fused dueling first layers: [128, 256] (value | advantage).
    wh = jnp.concatenate([p["wv1"], p["wa1"]], axis=1)                 # [128, 256]
    bh = jnp.concatenate([p["bv1"], p["ba1"]]).reshape(1, 2 * HL2)

    # Fused final projection with the dueling combine folded in:
    #   Q_j = v . wv + a . (wa[:,j] - mean_k wa[:,k]) + (bv + ba_j - mean(ba))
    # Rows 0..127 of wf consume the value hidden, rows 128..255 the advantage
    # hidden.  Output lanes 0..63 carry Q directly; lanes 64..127 stay 0.
    wa_centered = p["wa"] - jnp.mean(p["wa"], axis=1, keepdims=True)   # [128, 64]
    wv_tiled = jnp.tile(p["wv"], (1, ACTION_DIM))                      # [128, 64]
    wf = jnp.zeros((2 * HL2, LANE), f32)
    wf = wf.at[:HL2, :ACTION_DIM].set(wv_tiled)
    wf = wf.at[HL2:, :ACTION_DIM].set(wa_centered)
    bf = jnp.zeros((1, LANE), f32)
    bf = bf.at[0, :ACTION_DIM].set(p["ba"] - jnp.mean(p["ba"]) + p["bv"][0])

    return dict(we=we_ext, be=be_ext, mask=field_mask, w1=w1p, b1=b1,
                w2=w2, b2=b2, wh=wh, bh=bh, wf=wf, bf=bf)


def dqn_forward_pallas(x, fp):
    B = x.shape[0]
    # Adaptive batch tile: full 128-row tiles for large batches, otherwise the
    # smallest multiple of 8 covering the batch (keeps (8,128) tiling legal
    # without padding tiny batches all the way to 128 rows).
    tile_b = TILE_B if B >= TILE_B else max(8, ((B + 7) // 8) * 8)
    bp = ((B + tile_b - 1) // tile_b) * tile_b
    # Single lane-dense input slab: [field(16) | moves(80) | zeros(32)].
    xin = jnp.pad(x, ((0, bp - B), (0, LANE - STATE)))

    def rep(shape):
        # Weight/bias blocks: full array, resident across all grid steps.
        return pl.BlockSpec(shape, lambda i, _s=shape: (0,) * len(_s))

    in_specs = [
        pl.BlockSpec((tile_b, LANE), lambda i: (i, 0)),   # xin (batch-tiled)
        rep((1, LANE)),                                   # field mask
        rep((LANE, LANE)), rep((1, LANE)),                # embedder
        rep((LANE, HL1)), rep((1, HL1)),                  # fc1
        rep((HL1, HL2)), rep((1, HL2)),                   # fc2
        rep((HL2, 2 * HL2)), rep((1, 2 * HL2)),           # fused v/a hidden
        rep((2 * HL2, LANE)), rep((1, LANE)),             # fused final proj (Q)
    ]

    q_pad = pl.pallas_call(
        dqn_kernel,
        out_shape=jax.ShapeDtypeStruct((bp, LANE), jnp.float32),
        grid=(bp // tile_b,),
        in_specs=in_specs,
        out_specs=pl.BlockSpec((tile_b, LANE), lambda i: (i, 0)),
        compiler_params=pltpu.CompilerParams(
            dimension_semantics=("parallel",)),           # v7x: shard over 2 TCs
    )(xin, fp["mask"], fp["we"], fp["be"], fp["w1"], fp["b1"],
      fp["w2"], fp["b2"], fp["wh"], fp["bh"], fp["wf"], fp["bf"])

    return q_pad[:B, :ACTION_DIM]


def dqn_forward_ref(x, p):
    """Pure-JAX reference mirroring the PyTorch forward."""
    field = x[:, :FIELD_DIM]
    moves = x[:, FIELD_DIM:].reshape(-1, N_MOVES, MOVE)
    emb = jax.nn.relu(jnp.einsum("bnm,me->bne", moves, p["we"]) + p["be"])
    emb = emb.reshape(x.shape[0], N_MOVES * EMBEDDED_MOVE)
    fused = jnp.concatenate([field, emb], axis=1)
    h = jax.nn.relu(fused @ p["w1"] + p["b1"])
    h = jax.nn.relu(h @ p["w2"] + p["b2"])
    v = jax.nn.relu(h @ p["wv1"] + p["bv1"])
    V = v @ p["wv"] + p["bv"]
    a = jax.nn.relu(h @ p["wa1"] + p["ba1"])
    A = a @ p["wa"] + p["ba"]
    return V + A - jnp.mean(A, axis=1, keepdims=True)


if __name__ == "__main__":
    key = jax.random.PRNGKey(0)
    kx, kp = jax.random.split(key)
    x = jax.random.normal(kx, (BATCH, STATE), dtype=jnp.float32)
    params = make_params(kp)

    # One-time weight fusion (hoisted out of the per-call path).
    fused_params = prepare_fused_params(params)

    fwd = jax.jit(dqn_forward_pallas)
    q = jax.block_until_ready(fwd(x, fused_params))

    q_ref = dqn_forward_ref(x, params)
    np.testing.assert_allclose(np.asarray(q), np.asarray(q_ref), rtol=1e-4, atol=1e-4)

    print("KERNEL_OK")
</pallas_src>

<mosaic_0001>
module attributes {stable_mosaic.version = 11 : i64} {
  func.func @dqn_kernel(%arg0: i32, %arg1: memref<128x128xf32, #tpu.memory_space<vmem>>, %arg2: memref<1x128xf32, #tpu.memory_space<vmem>>, %arg3: memref<128x128xf32, #tpu.memory_space<vmem>>, %arg4: memref<1x128xf32, #tpu.memory_space<vmem>>, %arg5: memref<128x256xf32, #tpu.memory_space<vmem>>, %arg6: memref<1x256xf32, #tpu.memory_space<vmem>>, %arg7: memref<256x128xf32, #tpu.memory_space<vmem>>, %arg8: memref<1x128xf32, #tpu.memory_space<vmem>>, %arg9: memref<128x256xf32, #tpu.memory_space<vmem>>, %arg10: memref<1x256xf32, #tpu.memory_space<vmem>>, %arg11: memref<256x128xf32, #tpu.memory_space<vmem>>, %arg12: memref<1x128xf32, #tpu.memory_space<vmem>>, %arg13: memref<128x128xf32, #tpu.memory_space<vmem>>) attributes {dimension_semantics = [#tpu.dimension_semantics<parallel>], iteration_bounds = array<i64: 2>, scalar_prefetch = 0 : i64, scratch_operands = 0 : i64, tpu.core_type = #tpu.core_type<tc>, window_params = [{transform_indices = @transform_0, window_bounds = array<i64: 128, 128>}, {pipeline_mode = #tpu.pipeline_mode<synchronous>, transform_indices = @transform_1, window_bounds = array<i64: 1, 128>}, {pipeline_mode = #tpu.pipeline_mode<synchronous>, transform_indices = @transform_2, window_bounds = array<i64: 128, 128>}, {pipeline_mode = #tpu.pipeline_mode<synchronous>, transform_indices = @transform_3, window_bounds = array<i64: 1, 128>}, {pipeline_mode = #tpu.pipeline_mode<synchronous>, transform_indices = @transform_4, window_bounds = array<i64: 128, 256>}, {pipeline_mode = #tpu.pipeline_mode<synchronous>, transform_indices = @transform_5, window_bounds = array<i64: 1, 256>}, {pipeline_mode = #tpu.pipeline_mode<synchronous>, transform_indices = @transform_6, window_bounds = array<i64: 256, 128>}, {pipeline_mode = #tpu.pipeline_mode<synchronous>, transform_indices = @transform_7, window_bounds = array<i64: 1, 128>}, {pipeline_mode = #tpu.pipeline_mode<synchronous>, transform_indices = @transform_8, window_bounds = array<i64: 128, 256>}, {pipeline_mode = #tpu.pipeline_mode<synchronous>, transform_indices = @transform_9, window_bounds = array<i64: 1, 256>}, {pipeline_mode = #tpu.pipeline_mode<synchronous>, transform_indices = @transform_10, window_bounds = array<i64: 256, 128>}, {pipeline_mode = #tpu.pipeline_mode<synchronous>, transform_indices = @transform_11, window_bounds = array<i64: 1, 128>}, {transform_indices = @transform_12, window_bounds = array<i64: 128, 128>}]} {
    %c0 = arith.constant 0 : index
    %c0_0 = arith.constant 0 : index
    %0 = vector.load %arg1[%c0, %c0_0] : memref<128x128xf32, #tpu.memory_space<vmem>>, vector<128x128xf32>
    %c0_1 = arith.constant 0 : index
    %c0_2 = arith.constant 0 : index
    %1 = vector.load %arg3[%c0_1, %c0_2] : memref<128x128xf32, #tpu.memory_space<vmem>>, vector<128x128xf32>
    %cst = arith.constant dense<0.000000e+00> : vector<128x128xf32>
    %2 = tpu.matmul %0, %1, %cst {dimension_numbers = #tpu.dot_dimension_numbers<[1], [0], [0], [1], [0, 0, 1, 1], [], []>} : vector<128x128xf32>, vector<128x128xf32>, vector<128x128xf32> -> vector<128x128xf32>
    %c0_3 = arith.constant 0 : index
    %c0_4 = arith.constant 0 : index
    %3 = vector.load %arg4[%c0_3, %c0_4] : memref<1x128xf32, #tpu.memory_space<vmem>>, vector<1x128xf32>
    %4 = vector.broadcast %3 : vector<1x128xf32> to vector<128x128xf32>
    %5 = arith.addf %2, %4 : vector<128x128xf32>
    %cst_5 = arith.constant 0.000000e+00 : f32
    %6 = vector.broadcast %cst_5 : f32 to vector<128x128xf32>
    %7 = arith.maximumf %5, %6 : vector<128x128xf32>
    %c0_6 = arith.constant 0 : index
    %c0_7 = arith.constant 0 : index
    %8 = vector.load %arg2[%c0_6, %c0_7] : memref<1x128xf32, #tpu.memory_space<vmem>>, vector<1x128xf32>
    %9 = vector.broadcast %8 : vector<1x128xf32> to vector<128x128xf32>
    %10 = arith.mulf %0, %9 : vector<128x128xf32>
    %11 = arith.addf %7, %10 : vector<128x128xf32>
    %c0_8 = arith.constant 0 : index
    %c0_9 = arith.constant 0 : index
    %12 = vector.load %arg5[%c0_8, %c0_9] : memref<128x256xf32, #tpu.memory_space<vmem>>, vector<128x256xf32>
    %cst_10 = arith.constant dense<0.000000e+00> : vector<128x256xf32>
    %13 = tpu.matmul %11, %12, %cst_10 {dimension_numbers = #tpu.dot_dimension_numbers<[1], [0], [0], [1], [0, 0, 1, 1], [], []>} : vector<128x128xf32>, vector<128x256xf32>, vector<128x256xf32> -> vector<128x256xf32>
    %c0_11 = arith.constant 0 : index
    %c0_12 = arith.constant 0 : index
    %14 = vector.load %arg6[%c0_11, %c0_12] : memref<1x256xf32, #tpu.memory_space<vmem>>, vector<1x256xf32>
    %15 = vector.broadcast %14 : vector<1x256xf32> to vector<128x256xf32>
    %16 = arith.addf %13, %15 : vector<128x256xf32>
    %cst_13 = arith.constant 0.000000e+00 : f32
    %17 = vector.broadcast %cst_13 : f32 to vector<128x256xf32>
    %18 = arith.maximumf %16, %17 : vector<128x256xf32>
    %c0_14 = arith.constant 0 : index
    %c0_15 = arith.constant 0 : index
    %19 = vector.load %arg7[%c0_14, %c0_15] : memref<256x128xf32, #tpu.memory_space<vmem>>, vector<256x128xf32>
    %cst_16 = arith.constant dense<0.000000e+00> : vector<128x128xf32>
    %20 = tpu.matmul %18, %19, %cst_16 {dimension_numbers = #tpu.dot_dimension_numbers<[1], [0], [0], [1], [0, 0, 1, 1], [], []>} : vector<128x256xf32>, vector<256x128xf32>, vector<128x128xf32> -> vector<128x128xf32>
    %c0_17 = arith.constant 0 : index
    %c0_18 = arith.constant 0 : index
    %21 = vector.load %arg8[%c0_17, %c0_18] : memref<1x128xf32, #tpu.memory_space<vmem>>, vector<1x128xf32>
    %22 = vector.broadcast %21 : vector<1x128xf32> to vector<128x128xf32>
    %23 = arith.addf %20, %22 : vector<128x128xf32>
    %cst_19 = arith.constant 0.000000e+00 : f32
    %24 = vector.broadcast %cst_19 : f32 to vector<128x128xf32>
    %25 = arith.maximumf %23, %24 : vector<128x128xf32>
    %c0_20 = arith.constant 0 : index
    %c0_21 = arith.constant 0 : index
    %26 = vector.load %arg9[%c0_20, %c0_21] : memref<128x256xf32, #tpu.memory_space<vmem>>, vector<128x256xf32>
    %cst_22 = arith.constant dense<0.000000e+00> : vector<128x256xf32>
    %27 = tpu.matmul %25, %26, %cst_22 {dimension_numbers = #tpu.dot_dimension_numbers<[1], [0], [0], [1], [0, 0, 1, 1], [], []>} : vector<128x128xf32>, vector<128x256xf32>, vector<128x256xf32> -> vector<128x256xf32>
    %c0_23 = arith.constant 0 : index
    %c0_24 = arith.constant 0 : index
    %28 = vector.load %arg10[%c0_23, %c0_24] : memref<1x256xf32, #tpu.memory_space<vmem>>, vector<1x256xf32>
    %29 = vector.broadcast %28 : vector<1x256xf32> to vector<128x256xf32>
    %30 = arith.addf %27, %29 : vector<128x256xf32>
    %cst_25 = arith.constant 0.000000e+00 : f32
    %31 = vector.broadcast %cst_25 : f32 to vector<128x256xf32>
    %32 = arith.maximumf %30, %31 : vector<128x256xf32>
    %c0_26 = arith.constant 0 : index
    %c0_27 = arith.constant 0 : index
    %33 = vector.load %arg11[%c0_26, %c0_27] : memref<256x128xf32, #tpu.memory_space<vmem>>, vector<256x128xf32>
    %cst_28 = arith.constant dense<0.000000e+00> : vector<128x128xf32>
    %34 = tpu.matmul %32, %33, %cst_28 {dimension_numbers = #tpu.dot_dimension_numbers<[1], [0], [0], [1], [0, 0, 1, 1], [], []>} : vector<128x256xf32>, vector<256x128xf32>, vector<128x128xf32> -> vector<128x128xf32>
    %c0_29 = arith.constant 0 : index
    %c0_30 = arith.constant 0 : index
    %35 = vector.load %arg12[%c0_29, %c0_30] : memref<1x128xf32, #tpu.memory_space<vmem>>, vector<1x128xf32>
    %36 = vector.broadcast %35 : vector<1x128xf32> to vector<128x128xf32>
    %37 = arith.addf %34, %36 : vector<128x128xf32>
    %c0_31 = arith.constant 0 : index
    %c0_32 = arith.constant 0 : index
    %38 = vector.load %arg13[%c0_31, %c0_32] : memref<128x128xf32, #tpu.memory_space<vmem>>, vector<128x128xf32>
    tpu.vector_store %arg13[%c0_31, %c0_32], %37 {strides = array<i32>} : memref<128x128xf32, #tpu.memory_space<vmem>>, vector<128x128xf32>,
    return
  }
  func.func @transform_0(%arg0: i32) -> (i32, i32) {
    %c0_i32 = arith.constant 0 : i32
    %c0_i32_0 = arith.constant 0 : i32
    return %arg0, %c0_i32 : i32, i32
  }
  func.func @transform_1(%arg0: i32) -> (i32, i32) {
    %c0_i32 = arith.constant 0 : i32
    %c0_i32_0 = arith.constant 0 : i32
    %c0_i32_1 = arith.constant 0 : i32
    return %c0_i32, %c0_i32_0 : i32, i32
  }
  func.func @transform_2(%arg0: i32) -> (i32, i32) {
    %c0_i32 = arith.constant 0 : i32
    %c0_i32_0 = arith.constant 0 : i32
    %c0_i32_1 = arith.constant 0 : i32
    return %c0_i32, %c0_i32_0 : i32, i32
  }
  func.func @transform_3(%arg0: i32) -> (i32, i32) {
    %c0_i32 = arith.constant 0 : i32
    %c0_i32_0 = arith.constant 0 : i32
    %c0_i32_1 = arith.constant 0 : i32
    return %c0_i32, %c0_i32_0 : i32, i32
  }
  func.func @transform_4(%arg0: i32) -> (i32, i32) {
    %c0_i32 = arith.constant 0 : i32
    %c0_i32_0 = arith.constant 0 : i32
    %c0_i32_1 = arith.constant 0 : i32
    return %c0_i32, %c0_i32_0 : i32, i32
  }
  func.func @transform_5(%arg0: i32) -> (i32, i32) {
    %c0_i32 = arith.constant 0 : i32
    %c0_i32_0 = arith.constant 0 : i32
    %c0_i32_1 = arith.constant 0 : i32
    return %c0_i32, %c0_i32_0 : i32, i32
  }
  func.func @transform_6(%arg0: i32) -> (i32, i32) {
    %c0_i32 = arith.constant 0 : i32
    %c0_i32_0 = arith.constant 0 : i32
    %c0_i32_1 = arith.constant 0 : i32
    return %c0_i32, %c0_i32_0 : i32, i32
  }
  func.func @transform_7(%arg0: i32) -> (i32, i32) {
    %c0_i32 = arith.constant 0 : i32
    %c0_i32_0 = arith.constant 0 : i32
    %c0_i32_1 = arith.constant 0 : i32
    return %c0_i32, %c0_i32_0 : i32, i32
  }
  func.func @transform_8(%arg0: i32) -> (i32, i32) {
    %c0_i32 = arith.constant 0 : i32
    %c0_i32_0 = arith.constant 0 : i32
    %c0_i32_1 = arith.constant 0 : i32
    return %c0_i32, %c0_i32_0 : i32, i32
  }
  func.func @transform_9(%arg0: i32) -> (i32, i32) {
    %c0_i32 = arith.constant 0 : i32
    %c0_i32_0 = arith.constant 0 : i32
    %c0_i32_1 = arith.constant 0 : i32
    return %c0_i32, %c0_i32_0 : i32, i32
  }
  func.func @transform_10(%arg0: i32) -> (i32, i32) {
    %c0_i32 = arith.constant 0 : i32
    %c0_i32_0 = arith.constant 0 : i32
    %c0_i32_1 = arith.constant 0 : i32
    return %c0_i32, %c0_i32_0 : i32, i32
  }
  func.func @transform_11(%arg0: i32) -> (i32, i32) {
    %c0_i32 = arith.constant 0 : i32
    %c0_i32_0 = arith.constant 0 : i32
    %c0_i32_1 = arith.constant 0 : i32
    return %c0_i32, %c0_i32_0 : i32, i32
  }
  func.func @transform_12(%arg0: i32) -> (i32, i32) {
    %c0_i32 = arith.constant 0 : i32
    %c0_i32_0 = arith.constant 0 : i32
    return %arg0, %c0_i32 : i32, i32
  }
}

</mosaic_0001>

<bundles_post_ra>
// kernel: dqn_forward_pallas.1
= control target key start
LH: loop header
LB: loop body
LE: loop exit
PB: predicated region body
PF: predicated region fallthrough
CT: control target
= control target key end

     0   :  { %17 = vsyncpa [#allocation3], 0  ;;  %s2968_s0 = inlined_call_operand.vmem [shape: f32[256,128], index: 0, kind: input, shape index: {}]   ;;  %s2969_s1 = inlined_call_operand.vmem [shape: f32[1,128], index: 1, kind: input, shape index: {}]   ;;  %s2970_s2 = inlined_call_operand.hbm [shape: f32[128,128], index: 2, kind: input, shape index: {}]   ;;  %s2971_s3 = inlined_call_operand.vmem [shape: f32[1,128], index: 3, kind: input, shape index: {}]   ;;  %s2972_s4 = inlined_call_operand.vmem [shape: f32[128,256], index: 4, kind: input, shape index: {}]   ;;  %s2973_s5 = inlined_call_operand.vmem [shape: f32[1,256], index: 5, kind: input, shape index: {}]   ;;  %s2974_s6 = inlined_call_operand.vmem [shape: f32[256,128], index: 6, kind: input, shape index: {}]   ;;  %s2975_s7 = inlined_call_operand.vmem [shape: f32[1,128], index: 7, kind: input, shape index: {}]   ;;  %s2976_s8 = inlined_call_operand.vmem [shape: f32[128,256], index: 8, kind: input, shape index: {}]   ;;  %s2977_s9 = inlined_call_operand.vmem [shape: f32[1,256], index: 9, kind: input, shape index: {}]   ;;  %s2978_s10 = inlined_call_operand.hbm [shape: f32[256,128], index: 10, kind: input, shape index: {}]   ;;  %s2979_s11 = inlined_call_operand.vmem [shape: f32[1,128], index: 11, kind: input, shape index: {}]   ;;  %s2980_s12 = inlined_call_operand.vmem [shape: f32[256,128], index: 12, kind: output, shape index: {}]  }
   0x1   :  { %18 = vsyncpa [#allocation5], 0  ;;  %s2255_s21 = smov 0  }
   0x2 LB: > { %s1638_s22 = sadd.s32 4294967295, %s2183_s21   ;;  %p1640_p0 = scmp.ge.s32.totalorder %s2183_s21, 1  ;;  %s2183_s21 = sphi %s2255_s21, %s24_s21  }
   0x3   : > { %p312_p1 = scmp.lt.s32.totalorder %s2183_s21, 3  ;;  %s2185_s23 = smov [#allocation2]  }
   0x4   : > { %s327_s24 = sshll.u32 %s2185_s23, 4  ;;  %p2269_p3 = scmp.eq.s32.totalorder %s1638_s22, 0  ;;  %s328_s24 = int_to_ptr.vmem [resolvable:$true] %s327_s24 }
   0x5   : > { %p2263_p2 = pnand %p1640_p0, %p312_p1  ;;  %s2186_s27 = smov [#allocation4]  }
   0x6   : > { %s2985_s26 = scalar_select %p2269_p3, 1, 0 }
   0x7   : > { %s2984_s25 = scalar_select %p2263_p2, 1, 0 }
   0x8   : > { %p2089_p4 = pneg %p2263_p2  ;;  %s361_s28 = sshll.u32 %s2186_s27, 4  ;;  %s2281_s28 = int_to_ptr.vmem [resolvable:$true] %s361_s28 }
   0x9   : > { %s2113_s14 = scalar_lea.hbm %s2970_s2, 2048 }
   0xa   : > { %p2277_p5 = pnand %p2269_p3, %p2089_p4  ;;  %p2114_p6 = scmp.ne.s32.totalorder %s2970_s2, %s2113_s14 }
   0xb   : > { %p2120_p10 = scmp.lt.u32.totalorder %s2113_s14, %s2970_s2 }
   0xc   : > { %p2115_p7 = pneg %p2277_p5 }
   0xe   : > { %p2116_p8 = pnand %p2115_p7, %p2114_p6 }
  0x10   : > { %p2117_p9 = pneg %p2116_p8 }
  0x12   : > { %p2122_p11 = pnand %p2120_p10, %p2117_p9 }
  0x14   : > { %2125 = shalt.err (!%p2122_p11)
}
  0x15   : > { %s2126_s19 = scalar_lea.vmem %s328_s24, 2048  ;;  %p2134_p1 = scmp.lt.s32.totalorder %s328_s24, %s328_s24 }
  0x16   : > { %p2127_p12 = scmp.ne.s32.totalorder %s328_s24, %s2126_s19  ;;  %p2135_p4 = scmp.lt.s32.totalorder %s2126_s19, %s2126_s19 }
  0x18   : > { %p2129_p13 = pnand %p2127_p12, %p2115_p7  ;;  %p2136_p3 = por %p2135_p4, %p2134_p1 }
  0x1a   : > { %p2130_p0 = pneg %p2129_p13 }
  0x1c   : > { %p2137_p2 = pnand %p2136_p3, %p2130_p0 }
  0x1e   : > { %2140 = shalt.err (!%p2137_p2)
}
  0x1f   : > { %s2187_s20 = smov 128   ;;  %s2188_s23 = smov 8  }
  0x20   : > { %2092 = dma.hbm_to_vmem [thread:$0]  (!%p2277_p5), %s2970_s2, 2048, %s328_s24, [#allocation3], %s2187_s20, %s2187_s20, %s2188_s23  }
  0x21   : > { %s2141_s15 = scalar_lea.hbm %s2978_s10, 4096 }
  0x22   : > { %p2142_p6 = scmp.ne.s32.totalorder %s2978_s10, %s2141_s15  ;;  %p2148_p8 = scmp.lt.u32.totalorder %s2141_s15, %s2978_s10 }
  0x24   : > { %p2144_p2 = pnand %p2142_p6, %p2115_p7 }
  0x26   : > { %p2145_p3 = pneg %p2144_p2 }
  0x28   : > { %p2150_p9 = pnand %p2148_p8, %p2145_p3 }
  0x2a   : > { %2153 = shalt.err (!%p2150_p9)
}
  0x2b   : > { %s2154_s24 = scalar_lea.vmem %s2281_s28, 4096  ;;  %p2162_p13 = scmp.lt.s32.totalorder %s2281_s28, %s2281_s28 }
  0x2c   : > { %p2155_p10 = scmp.ne.s32.totalorder %s2281_s28, %s2154_s24  ;;  %p2163_p0 = scmp.lt.s32.totalorder %s2154_s24, %s2154_s24 }
  0x2e   : > { %p2157_p11 = pnand %p2155_p10, %p2115_p7  ;;  %p2164_p1 = por %p2163_p0, %p2162_p13 }
  0x30   : > { %p2158_p12 = pneg %p2157_p11 }
  0x32   : > { %p2165_p4 = pnand %p2164_p1, %p2158_p12 }
  0x34   : > { %2168 = shalt.err (!%p2165_p4)
}
  0x35   : > { %2095 = dma.hbm_to_vmem [thread:$0]  (!%p2277_p5), %s2978_s10, 4096, %s2281_s28, [#allocation5], %s2187_s20, %s2187_s20, %s2188_s23  }
  0x36   : > { %p2987_p6 = scmp.ne.s32.totalorder %s2984_s25, 0 }
  0x37   : > { %p2988_p2 = scmp.ne.s32.totalorder (!%p2987_p6), %s2985_s26, 0 }
  0x38   : > { %389 = sbr.rel (%p2987_p6) target bundleno = 1253 (0x4e5), region = 68 }
  0x3f   : > { %2174 = dma.done.wait (%p2988_p2), [#allocation3], 2048  }
  0x40   : > { %2176 = vsyncadd (%p2988_p2), [#allocation3], 4294965248 }
  0x41   : > { %2178 = dma.done.wait (%p2988_p2), [#allocation5], 4096  }
  0x42   : > { %2180 = vsyncadd (%p2988_p2), [#allocation5], 4294963200  ;;  %s1647_s29 = sshll.u32 %s1638_s22, 4  ;;  %v463_v0 = vld [vmem:[#allocation2] sm:$0xff]  ;;  %v464_v1 = vld [vmem:[#allocation2 + $0x8] sm:$0xff] }
  0x43   : > { %p436_p7 = scmp.lt.s32.totalorder %s1647_s29, 31  ;;  %v465_v2 = vld [vmem:[#allocation2 + $0x10] sm:$0xff]  ;;  %v1905_v3 = vpack.c.bf16 %v464_v1, %v463_v0  ;;  %v466_v4 = vld [vmem:[#allocation2 + $0x18] sm:$0xff]  ;;  %v467_v6 = vld [vmem:[#allocation2 + $0x20] sm:$0xff] }
  0x44   : > { %v1909_v5 = vpack.c.bf16 %v466_v4, %v465_v2  ;;  %v468_v7 = vld [vmem:[#allocation2 + $0x28] sm:$0xff]  ;;  %v469_v10 = vld [vmem:[#allocation2 + $0x30] sm:$0xff]  ;;  %v470_v11 = vld [vmem:[#allocation2 + $0x38] sm:$0xff] }
  0x45   : > { %s2990_s29 = smov (!%p436_p7, %s1647_s29), 31  ;;  %1906 = vmatprep.subr.bf16.mxu0 %v1905_v3  ;;  %v1913_v8 = vpack.c.bf16 %v468_v7, %v467_v6  ;;  %v1917_v12 = vpack.c.bf16 %v470_v11, %v469_v10  ;;  %v471_v13 = vld [vmem:[#allocation2 + $0x40] sm:$0xff]  ;;  %v472_v14 = vld [vmem:[#allocation2 + $0x48] sm:$0xff]  ;;  %v689_v16 = vld [vmem:[%s2972_s4 + $0x18] sm:$0xff] }
  0x46   : > { %s1648_s25 = sshll.u32 %s2990_s29, 3  ;;  %1908 = vmatpush3.bf16.msra.mxu0 %v1905_v3  ;;  %v687_v15 = vld [vmem:[%s2972_s4 + $0x8] sm:$0xff]  ;;  %v686_v17 = vld [vmem:[%s2972_s4] sm:$0xff]  ;;  %v688_v19 = vld [vmem:[%s2972_s4 + $0x10] sm:$0xff]  ;;  %v1921_v22 = vpack.c.bf16 %v472_v14, %v471_v13 }
  0x47   : > { %s2350_s20 = scalar_lea.vmem %s2968_s0, %s1648_s25  ;;  %1910 = vmatprep.subr.bf16.mxu0 %v1909_v5  ;;  %v1937_v18 = vpack.c.bf16 %v689_v16, %v687_v15  ;;  %v691_v20 = vld [vmem:[%s2972_s4 + $0x28] sm:$0xff]  ;;  %v693_v21 = vld [vmem:[%s2972_s4 + $0x38] sm:$0xff]  ;;  %v1939_v23 = vpack.c.bf16 %v688_v19, %v686_v17  ;;  %v690_v25 = vld [vmem:[%s2972_s4 + $0x20] sm:$0xff] }
  0x48   : > { %v2353_v9 = vld [vmem:[%s2350_s20] sm:$0xff]  ;;  %v1941_v24 = vpack.c.bf16 %v693_v21, %v691_v20  ;;  %v692_v26 = vld [vmem:[%s2972_s4 + $0x30] sm:$0xff]  ;;  %v695_v27 = vld [vmem:[%s2972_s4 + $0x48] sm:$0xff] }
  0x49   : > { %1881 = vmatprep.mubr.f32.mxu0 %v2353_v9  ;;  %v473_v28 = vld [vmem:[#allocation2 + $0x50] sm:$0xff]  ;;  %v474_v29 = vld [vmem:[#allocation2 + $0x58] sm:$0xff]  ;;  %1938 = vmatprep.subr.bf16.mxu1 %v1937_v18  ;;  %v1943_v31 = vpack.c.bf16 %v692_v26, %v690_v25  ;;  %v694_v33 = vld [vmem:[%s2972_s4 + $0x40] sm:$0xff]  ;;  %v2189_v25 = vmov 0.0  }
  0x4a   : > { %1912 = vmatpush3.bf16.msra.mxu0 %v1909_v5  ;;  %v697_v30 = vld [vmem:[%s2972_s4 + $0x58] sm:$0xff]  ;;  %1940 = vmatpush1.bf16.msra.mxu1 %v1939_v23  ;;  %v696_v34 = vld [vmem:[%s2972_s4 + $0x50] sm:$0xff]  ;;  %v1925_v35 = vpack.c.bf16 %v474_v29, %v473_v28  ;;  %v699_v36 = vld [vmem:[%s2972_s4 + $0x68] sm:$0xff] }
  0x4b   : > { %1914 = vmatprep.subr.bf16.mxu0 %v1913_v8  ;;  %1942 = vmatprep.subr.bf16.mxu1 %v1941_v24  ;;  %v1945_v32 = vpack.c.bf16 %v697_v30, %v695_v27  ;;  %v701_v37 = vld [vmem:[%s2972_s4 + $0x78] sm:$0xff]  ;;  %v475_v38 = vld [vmem:[#allocation2 + $0x60] sm:$0xff]  ;;  %v476_v39 = vld [vmem:[#allocation2 + $0x68] sm:$0xff]  ;;  %v1947_v40 = vpack.c.bf16 %v696_v34, %v694_v33 }
  0x4c   : > { %v1949_v41 = vpack.c.bf16 %v701_v37, %v699_v36  ;;  %v698_v42 = vld [vmem:[%s2972_s4 + $0x60] sm:$0xff]  ;;  %v700_v43 = vld [vmem:[%s2972_s4 + $0x70] sm:$0xff]  ;;  %v1929_v44 = vpack.c.bf16 %v476_v39, %v475_v38  ;;  %v703_v45 = vld [vmem:[%s2972_s4 + $0x88] sm:$0xff]  ;;  %794 = vmatprep.mubr.f32.mxu1 %v2189_v25 }
  0x4d   : > { %v705_v46 = vld [vmem:[%s2972_s4 + $0x98] sm:$0xff]  ;;  %v477_v47 = vld [vmem:[#allocation2 + $0x70] sm:$0xff]  ;;  %v1951_v49 = vpack.c.bf16 %v700_v43, %v698_v42  ;;  %v702_v51 = vld [vmem:[%s2972_s4 + $0x80] sm:$0xff] }
  0x4e   : > { %1916 = vmatpush3.bf16.msra.mxu0 %v1913_v8  ;;  %1944 = vmatpush1.bf16.msra.mxu1 %v1943_v31  ;;  %v478_v48 = vld [vmem:[#allocation2 + $0x78] sm:$0xff]  ;;  %v1953_v50 = vpack.c.bf16 %v705_v46, %v703_v45  ;;  %v704_v52 = vld [vmem:[%s2972_s4 + $0x90] sm:$0xff]  ;;  %v707_v54 = vld [vmem:[%s2972_s4 + $0xa8] sm:$0xff] }
  0x4f   : > { %1918 = vmatprep.subr.bf16.mxu0 %v1917_v12  ;;  %1946 = vmatprep.subr.bf16.mxu1 %v1945_v32  ;;  %v1933_v53 = vpack.c.bf16 %v478_v48, %v477_v47  ;;  %v709_v55 = vld [vmem:[%s2972_s4 + $0xb8] sm:$0xff]  ;;  %v1955_v56 = vpack.c.bf16 %v704_v52, %v702_v51  ;;  %v706_v58 = vld [vmem:[%s2972_s4 + $0xa0] sm:$0xff]  ;;  %v708_v59 = vld [vmem:[%s2972_s4 + $0xb0] sm:$0xff] }
  0x50   : > { %v1957_v57 = vpack.c.bf16 %v709_v55, %v707_v54  ;;  %v1959_v60 = vpack.c.bf16 %v708_v59, %v706_v58  ;;  %v2429_v61 = vld [vmem:[%s2350_s20 + $0x8] sm:$0xff]  ;;  %v2432_v62 = vld [vmem:[%s2350_s20 + $0x10] sm:$0xff]  ;;  %v2437_v63 = vld [vmem:[%s2350_s20 + $0x18] sm:$0xff] }
  0x51   : > { %v2440_v0 = vld [vmem:[%s2350_s20 + $0x20] sm:$0xff]  ;;  %v2445_v1 = vld [vmem:[%s2350_s20 + $0x28] sm:$0xff]  ;;  %v2448_v2 = vld [vmem:[%s2350_s20 + $0x30] sm:$0xff] }
  0x52   : > { %1920 = vmatpush3.bf16.msra.mxu0 %v1917_v12  ;;  %1948 = vmatpush1.bf16.msra.mxu1 %v1947_v40  ;;  %v2453_v3 = vld [vmem:[%s2350_s20 + $0x38] sm:$0xff]  ;;  %v2456_v4 = vld [vmem:[%s2350_s20 + $0x40] sm:$0xff]  ;;  %v2461_v5 = vld [vmem:[%s2350_s20 + $0x48] sm:$0xff] }
  0x53   : > { %1922 = vmatprep.subr.bf16.mxu0 %v1921_v22  ;;  %1950 = vmatprep.subr.bf16.mxu1 %v1949_v41  ;;  %v2464_v6 = vld [vmem:[%s2350_s20 + $0x50] sm:$0xff]  ;;  %v2469_v7 = vld [vmem:[%s2350_s20 + $0x58] sm:$0xff]  ;;  %v2472_v8 = vld [vmem:[%s2350_s20 + $0x60] sm:$0xff] }
  0x54   : > { %v2477_v10 = vld [vmem:[%s2350_s20 + $0x68] sm:$0xff]  ;;  %v2480_v11 = vld [vmem:[%s2350_s20 + $0x70] sm:$0xff]  ;;  %v2485_v12 = vld [vmem:[%s2350_s20 + $0x78] sm:$0xff]  ;;  %s2931_s20 = scalar_lea.vmem %s2980_s12, %s1648_s25 }
  0x55   : > { %v711_v13 = vld [vmem:[%s2972_s4 + $0xc8] sm:$0xff]  ;;  %v713_v14 = vld [vmem:[%s2972_s4 + $0xd8] sm:$0xff]  ;;  %v710_v16 = vld [vmem:[%s2972_s4 + $0xc0] sm:$0xff] }
  0x56   : > { %1924 = vmatpush3.bf16.msra.mxu0 %v1921_v22  ;;  %1952 = vmatpush1.bf16.msra.mxu1 %v1951_v49  ;;  %v1961_v15 = vpack.c.bf16 %v713_v14, %v711_v13  ;;  %v712_v17 = vld [vmem:[%s2972_s4 + $0xd0] sm:$0xff]  ;;  %v715_v19 = vld [vmem:[%s2972_s4 + $0xe8] sm:$0xff]  ;;  %v717_v20 = vld [vmem:[%s2972_s4 + $0xf8] sm:$0xff] }
  0x57   : > { %1926 = vmatprep.subr.bf16.mxu0 %v1925_v35  ;;  %1954 = vmatprep.subr.bf16.mxu1 %v1953_v50  ;;  %v1963_v18 = vpack.c.bf16 %v712_v17, %v710_v16  ;;  %v1965_v21 = vpack.c.bf16 %v717_v20, %v715_v19  ;;  %v714_v22 = vld [vmem:[%s2972_s4 + $0xe0] sm:$0xff]  ;;  %v716_v23 = vld [vmem:[%s2972_s4 + $0xf0] sm:$0xff]  ;;  %v940_v27 = vld [vmem:[%s2974_s6 + $0x88] sm:$0xff] }
  0x58   : > { %v1967_v24 = vpack.c.bf16 %v716_v23, %v714_v22  ;;  %v939_v26 = vld [vmem:[%s2974_s6 + $0x80] sm:$0xff]  ;;  %v924_v30 = vld [vmem:[%s2974_s6 + $0x8] sm:$0xff]  ;;  %v941_v31 = vld [vmem:[%s2974_s6 + $0x90] sm:$0xff] }
  0x59   : > { %v923_v28 = vld [vmem:[%s2974_s6] sm:$0xff]  ;;  %v1969_v29 = vpack.c.bf16 %v940_v27, %v939_v26  ;;  %v942_v32 = vld [vmem:[%s2974_s6 + $0x98] sm:$0xff]  ;;  %v944_v38 = vld [vmem:[%s2974_s6 + $0xa8] sm:$0xff] }
  0x5a   : > { %1928 = vmatpush3.bf16.msra.mxu0 %v1925_v35  ;;  %1956 = vmatpush1.bf16.msra.mxu1 %v1955_v56  ;;  %v1971_v33 = vpack.c.bf16 %v924_v30, %v923_v28  ;;  %v1973_v34 = vpack.c.bf16 %v942_v32, %v941_v31  ;;  %v925_v35 = vld [vmem:[%s2974_s6 + $0x10] sm:$0xff]  ;;  %v926_v36 = vld [vmem:[%s2974_s6 + $0x18] sm:$0xff]  ;;  %v943_v37 = vld [vmem:[%s2974_s6 + $0xa0] sm:$0xff] }
  0x5b   : > { %1930 = vmatprep.subr.bf16.mxu0 %v1929_v44  ;;  %1958 = vmatprep.subr.bf16.mxu1 %v1957_v57  ;;  %v1975_v39 = vpack.c.bf16 %v926_v36, %v925_v35  ;;  %v1977_v40 = vpack.c.bf16 %v944_v38, %v943_v37  ;;  %v927_v41 = vld [vmem:[%s2974_s6 + $0x20] sm:$0xff]  ;;  %v928_v42 = vld [vmem:[%s2974_s6 + $0x28] sm:$0xff]  ;;  %v945_v43 = vld [vmem:[%s2974_s6 + $0xb0] sm:$0xff] }
  0x5c   : > { %v1979_v45 = vpack.c.bf16 %v928_v42, %v927_v41  ;;  %v929_v47 = vld [vmem:[%s2974_s6 + $0x30] sm:$0xff]  ;;  %v930_v48 = vld [vmem:[%s2974_s6 + $0x38] sm:$0xff]  ;;  %v947_v49 = vld [vmem:[%s2974_s6 + $0xc0] sm:$0xff] }
  0x5d   : > { %v948_v50 = vld [vmem:[%s2974_s6 + $0xc8] sm:$0xff]  ;;  %v1983_v51 = vpack.c.bf16 %v930_v48, %v929_v47  ;;  %v949_v55 = vld [vmem:[%s2974_s6 + $0xd0] sm:$0xff]  ;;  %v950_v56 = vld [vmem:[%s2974_s6 + $0xd8] sm:$0xff] }
  0x5e   : > { %1932 = vmatpush3.bf16.msra.mxu0 %v1929_v44  ;;  %1960 = vmatpush1.bf16.msra.mxu1 %v1959_v60  ;;  %v946_v44 = vld [vmem:[%s2974_s6 + $0xb8] sm:$0xff]  ;;  %v1985_v52 = vpack.c.bf16 %v948_v50, %v947_v49  ;;  %v932_v54 = vld [vmem:[%s2974_s6 + $0x48] sm:$0xff]  ;;  %v1989_v58 = vpack.c.bf16 %v950_v56, %v949_v55  ;;  %v933_v59 = vld [vmem:[%s2974_s6 + $0x50] sm:$0xff] }
  0x5f   : > { %1934 = vmatprep.subr.bf16.mxu0 %v1933_v53  ;;  %1962 = vmatprep.subr.bf16.mxu1 %v1961_v15  ;;  %v1981_v46 = vpack.c.bf16 %v946_v44, %v945_v43  ;;  %v934_v60 = vld [vmem:[%s2974_s6 + $0x58] sm:$0xff]  ;;  %v951_v13 = vld [vmem:[%s2974_s6 + $0xe0] sm:$0xff]  ;;  %v952_v14 = vld [vmem:[%s2974_s6 + $0xe8] sm:$0xff] }
  0x60   : > { %v1991_v15 = vpack.c.bf16 %v934_v60, %v933_v59  ;;  %v1993_v16 = vpack.c.bf16 %v952_v14, %v951_v13  ;;  %v935_v17 = vld [vmem:[%s2974_s6 + $0x60] sm:$0xff] }
  0x61   : > { %v2600_v20 = vld [vmem:[%s2969_s1] ss:$0 sm:$0xff] }
  0x62   : > { %1936 = vmatpush3.bf16.msra.mxu0 %v1933_v53  ;;  %1964 = vmatpush1.bf16.msra.mxu1 %v1963_v18  ;;  %v931_v53 = vld [vmem:[%s2974_s6 + $0x40] sm:$0xff]  ;;  %v936_v18 = vld [vmem:[%s2974_s6 + $0x68] sm:$0xff]  ;;  %v655_v23 = vmul.f32 %v2600_v20, %v2429_v61  ;;  %v654_v27 = vmul.f32 %v2600_v20, %v2353_v9  ;;  %v657_v32 = vmul.f32 %v2600_v20, %v2437_v63 }
  0x63   : > { %1966 = vmatprep.subr.bf16.mxu1 %v1965_v21  ;;  %1970 = vmatprep.subr.bf16.mxu0 %v1969_v29  ;;  %v1987_v57 = vpack.c.bf16 %v932_v54, %v931_v53  ;;  %v1995_v19 = vpack.c.bf16 %v936_v18, %v935_v17  ;;  %v2605_v21 = vld [vmem:[%s2971_s3] ss:$0 sm:$0xff]  ;;  %v658_v43 = vmul.f32 %v2600_v20, %v2440_v0 }
  0x64   : > { %v661_v48 = vmul.f32 %v2600_v20, %v2453_v3  ;;  %v663_v56 = vmul.f32 %v2600_v20, %v2461_v5  ;;  %v662_v59 = vmul.f32 %v2600_v20, %v2456_v4 }
  0x65   : > { %1882 = vmatmul.mubr.f32.vlgmr.msra.gmra.mrb[0].mxu0 %v2429_v61  ;;  %v656_v61 = vmul.f32 %v2600_v20, %v2432_v62 }
  0x66   : > { %1884 = vmatprep.mubr.f32.mxu0 %v2432_v62  ;;  %1968 = vmatpush1.bf16.msra.mxu1 %v1967_v24 }
  0x67   : > { %1972 = vmatpush3.bf16.msra.mxu0 %v1971_v33 }
  0x68   : > { %1974 = vmatprep.subr.bf16.mxu0 %v1973_v34 }
  0x69   : > { %1885 = vmatmul.mubr.f32.gmra.mrb[2].mxu0 %v2437_v63 }
  0x6a   : > { %1887 = vmatprep.mubr.f32.mxu0 %v2440_v0 }
  0x6b   : > { %1976 = vmatpush3.bf16.msra.mxu0 %v1975_v39 }
  0x6c   : > { %1978 = vmatprep.subr.bf16.mxu0 %v1977_v40  ;;  %v659_v40 = vmul.f32 %v2600_v20, %v2445_v1 }
  0x6d   : > { %1888 = vmatmul.mubr.f32.gmra.mrb[4].mxu0 %v2445_v1 }
  0x6e   : > { %1890 = vmatprep.mubr.f32.mxu0 %v2448_v2 }
  0x6f   : > { %1980 = vmatpush3.bf16.msra.mxu0 %v1979_v45 }
  0x70   : > { %1982 = vmatprep.subr.bf16.mxu0 %v1981_v46 }
  0x71   : > { %1891 = vmatmul.mubr.f32.gmra.mrb[6].mxu0 %v2453_v3 }
  0x72   : > { %1893 = vmatprep.mubr.f32.mxu0 %v2456_v4 }
  0x73   : > { %1984 = vmatpush3.bf16.msra.mxu0 %v1983_v51  ;;  %v660_v51 = vmul.f32 %v2600_v20, %v2448_v2 }
  0x74   : > { %1986 = vmatprep.subr.bf16.mxu0 %v1985_v52 }
  0x75   : > { %1894 = vmatmul.mubr.f32.gmra.mrb[8].mxu0 %v2461_v5 }
  0x76   : > { %1896 = vmatprep.mubr.f32.mxu0 %v2464_v6 }
  0x77   : > { %1988 = vmatpush3.bf16.msra.mxu0 %v1987_v57 }
  0x78   : > { %1990 = vmatprep.subr.bf16.mxu0 %v1989_v58 }
  0x79   : > { %1897 = vmatmul.mubr.f32.gmra.mrb[10].mxu0 %v2469_v7 }
  0x7a   : > { %1899 = vmatprep.mubr.f32.mxu0 %v2472_v8 }
  0x7b   : > { %1992 = vmatpush3.bf16.msra.mxu0 %v1991_v15 }
  0x7c   : > { %1994 = vmatprep.subr.bf16.mxu0 %v1993_v16  ;;  %v665_v16 = vmul.f32 %v2600_v20, %v2469_v7 }
  0x7d   : > { %1900 = vmatmul.mubr.f32.gmra.mrb[12].mxu0 %v2477_v10 }
  0x7e   : > { %1902 = vmatprep.mubr.f32.mxu0 %v2480_v11 }
  0x7f   : > { %1996 = vmatpush3.bf16.msra.mxu0 %v1995_v19  ;;  %v664_v19 = vmul.f32 %v2600_v20, %v2464_v6 }
  0x81   : > { %1903 = vmatmul.mubr.f32.gmra.mrb[14].mxu0 %v2485_v12 }
 0x138   : > { %v1883_v22 = vpop.f32.mrb[0].mxu0 }
 0x139   : > { %v558_v24 = vadd.f32 %v1883_v22, %v2605_v21  ;;  %v552_v26 = vpop.f32.mrb[1].mxu0 }
 0x13a   : > { %v553_v28 = vadd.f32 %v2605_v21, %v552_v26 }
 0x13b   : > { %v632_v29 = vmax.f32 %v558_v24, 0.0 }
 0x13c   : > { %v631_v30 = vmax.f32 %v553_v28, 0.0  ;;  %v1886_v31 = vpop.f32.mrb[2].mxu0 }
 0x13d   : > { %v671_v33 = vadd.f32 %v655_v23, %v632_v29  ;;  %v568_v34 = vadd.f32 %v1886_v31, %v2605_v21  ;;  %v562_v35 = vpop.f32.mrb[3].mxu0 }
 0x13e   : > { %v670_v36 = vadd.f32 %v654_v27, %v631_v30  ;;  %v563_v37 = vadd.f32 %v2605_v21, %v562_v35  ;;  %v667_v27 = vmul.f32 %v2600_v20, %v2477_v10  ;;  %v666_v30 = vmul.f32 %v2600_v20, %v2472_v8 }
 0x13f   : > { %v634_v38 = vmax.f32 %v568_v34, 0.0  ;;  %v669_v35 = vmul.f32 %v2600_v20, %v2485_v12  ;;  %v954_v12 = vld [vmem:[%s2974_s6 + $0xf8] sm:$0xff] }
 0x140   : > { %v633_v9 = vmax.f32 %v563_v37, 0.0  ;;  %795 = vmatmul.mubr.f32.vlgmr.msra.gmra.mrb[0].mxu1 %v670_v36  ;;  %v1889_v39 = vpop.f32.mrb[4].mxu0  ;;  %v668_v37 = vmul.f32 %v2600_v20, %v2480_v11  ;;  %v953_v11 = vld [vmem:[%s2974_s6 + $0xf0] sm:$0xff] }
 0x141   : > { %v673_v41 = vadd.f32 %v657_v32, %v634_v38  ;;  %800 = vmatprep.mubr.f32.mxu1 %v2189_v25  ;;  %v578_v63 = vadd.f32 %v1889_v39, %v2605_v21  ;;  %v572_v42 = vpop.f32.mrb[5].mxu0  ;;  %v1997_v20 = vpack.c.bf16 %v954_v12, %v953_v11 }
 0x142   : > { %v672_v62 = vadd.f32 %v656_v61, %v633_v9  ;;  %v573_v44 = vadd.f32 %v2605_v21, %v572_v42 }
 0x143   : > { %v636_v45 = vmax.f32 %v578_v63, 0.0  ;;  %v938_v63 = vld [vmem:[%s2974_s6 + $0x78] sm:$0xff]  ;;  %1998 = vmatprep.subr.bf16.mxu0 %v1997_v20 }
 0x144   : > { %801 = vmatmul.mubr.f32.gmra.mrb[2].mxu1 %v671_v33  ;;  %v635_v46 = vmax.f32 %v573_v44, 0.0  ;;  %v1892_v47 = vpop.f32.mrb[6].mxu0  ;;  %v1123_v44 = vld [vmem:[%s2976_s8] sm:$0xff] }
 0x145   : > { %v675_v1 = vadd.f32 %v659_v40, %v636_v45  ;;  %806 = vmatprep.mubr.f32.mxu1 %v2189_v25  ;;  %v588_v49 = vadd.f32 %v1892_v47, %v2605_v21  ;;  %v582_v50 = vpop.f32.mrb[7].mxu0  ;;  %v1128_v47 = vld [vmem:[%s2976_s8 + $0x28] sm:$0xff] }
 0x146   : > { %v674_v0 = vadd.f32 %v658_v43, %v635_v46  ;;  %v583_v52 = vadd.f32 %v2605_v21, %v582_v50  ;;  %v1124_v43 = vld [vmem:[%s2976_s8 + $0x8] sm:$0xff]  ;;  %v1125_v46 = vld [vmem:[%s2976_s8 + $0x10] sm:$0xff]  ;;  %v1127_v50 = vld [vmem:[%s2976_s8 + $0x20] sm:$0xff] }
 0x147   : > { %v638_v53 = vmax.f32 %v588_v49, 0.0 }
 0x148   : > { %807 = vmatmul.mubr.f32.gmra.mrb[4].mxu1 %v672_v62  ;;  %v637_v54 = vmax.f32 %v583_v52, 0.0  ;;  %v1895_v55 = vpop.f32.mrb[8].mxu0  ;;  %v1126_v62 = vld [vmem:[%s2976_s8 + $0x18] sm:$0xff] }
 0x149   : > { %812 = vmatprep.mubr.f32.mxu1 %v2189_v25  ;;  %v677_v3 = vadd.f32 %v661_v48, %v638_v53  ;;  %v598_v57 = vadd.f32 %v1895_v55, %v2605_v21  ;;  %v592_v58 = vpop.f32.mrb[9].mxu0  ;;  %v2001_v45 = vpack.c.bf16 %v1126_v62, %v1124_v43  ;;  %v1130_v48 = vld [vmem:[%s2976_s8 + $0x38] sm:$0xff]  ;;  %v1131_v55 = vld [vmem:[%s2976_s8 + $0x40] sm:$0xff] }
 0x14a   : > { %v676_v2 = vadd.f32 %v660_v51, %v637_v54  ;;  %v593_v60 = vadd.f32 %v2605_v21, %v592_v58  ;;  %v2005_v49 = vpack.c.bf16 %v1130_v48, %v1128_v47  ;;  %v1129_v51 = vld [vmem:[%s2976_s8 + $0x30] sm:$0xff]  ;;  %v1134_v52 = vld [vmem:[%s2976_s8 + $0x58] sm:$0xff] }
 0x14b   : > { %v640_v13 = vmax.f32 %v598_v57, 0.0  ;;  %2002 = vmatprep.subr.bf16.mxu1 %v2001_v45  ;;  %v2007_v53 = vpack.c.bf16 %v1129_v51, %v1127_v50  ;;  %v1138_v57 = vld [vmem:[%s2976_s8 + $0x78] sm:$0xff] }
 0x14c   : > { %813 = vmatmul.mubr.f32.gmra.mrb[6].mxu1 %v673_v41  ;;  %v639_v14 = vmax.f32 %v593_v60, 0.0  ;;  %v1898_v15 = vpop.f32.mrb[10].mxu0  ;;  %v1137_v60 = vld [vmem:[%s2976_s8 + $0x70] sm:$0xff] }
 0x14d   : > { %818 = vmatprep.mubr.f32.mxu1 %v2189_v25  ;;  %v679_v5 = vadd.f32 %v663_v56, %v640_v13  ;;  %v608_v17 = vadd.f32 %v1898_v15, %v2605_v21  ;;  %v602_v18 = vpop.f32.mrb[11].mxu0  ;;  %v1133_v56 = vld [vmem:[%s2976_s8 + $0x50] sm:$0xff]  ;;  %v1140_v13 = vld [vmem:[%s2976_s8 + $0x88] sm:$0xff] }
 0x14e   : > { %v678_v4 = vadd.f32 %v662_v59, %v639_v14  ;;  %v603_v22 = vadd.f32 %v2605_v21, %v602_v18  ;;  %v2011_v58 = vpack.c.bf16 %v1133_v56, %v1131_v55  ;;  %v1142_v14 = vld [vmem:[%s2976_s8 + $0x98] sm:$0xff]  ;;  %v1144_v18 = vld [vmem:[%s2976_s8 + $0xa8] sm:$0xff] }
 0x14f   : > { %v642_v23 = vmax.f32 %v608_v17, 0.0  ;;  %v1141_v17 = vld [vmem:[%s2976_s8 + $0x90] sm:$0xff] }
 0x150   : > { %819 = vmatmul.mubr.f32.gmra.mrb[8].mxu1 %v674_v0  ;;  %v641_v24 = vmax.f32 %v603_v22, 0.0  ;;  %v1901_v26 = vpop.f32.mrb[12].mxu0  ;;  %v1132_v0 = vld [vmem:[%s2976_s8 + $0x48] sm:$0xff] }
 0x151   : > { %824 = vmatprep.mubr.f32.mxu1 %v2189_v25  ;;  %v681_v7 = vadd.f32 %v665_v16, %v642_v23  ;;  %v618_v28 = vadd.f32 %v1901_v26, %v2605_v21  ;;  %v612_v29 = vpop.f32.mrb[13].mxu0  ;;  %v2009_v54 = vpack.c.bf16 %v1134_v52, %v1132_v0  ;;  %v2017_v16 = vpack.c.bf16 %v1142_v14, %v1140_v13  ;;  %v1143_v23 = vld [vmem:[%s2976_s8 + $0xa0] sm:$0xff]  ;;  %v1148_v26 = vld [vmem:[%s2976_s8 + $0xc8] sm:$0xff] }
 0x152   : > { %v680_v6 = vadd.f32 %v664_v19, %v641_v24  ;;  %v613_v31 = vadd.f32 %v2605_v21, %v612_v29  ;;  %v1146_v19 = vld [vmem:[%s2976_s8 + $0xb8] sm:$0xff]  ;;  %v1145_v24 = vld [vmem:[%s2976_s8 + $0xb0] sm:$0xff]  ;;  %v1147_v29 = vld [vmem:[%s2976_s8 + $0xc0] sm:$0xff] }
 0x153   : > { %v644_v32 = vmax.f32 %v618_v28, 0.0  ;;  %v2021_v22 = vpack.c.bf16 %v1146_v19, %v1144_v18 }
 0x154   : > { %825 = vmatmul.mubr.f32.gmra.mrb[10].mxu1 %v675_v1  ;;  %v643_v33 = vmax.f32 %v613_v31, 0.0  ;;  %v1904_v34 = vpop.f32.mrb[14].mxu0  ;;  %v2003_v1 = vpack.c.bf16 %v1125_v46, %v1123_v44  ;;  %v1154_v31 = vld [vmem:[%s2976_s8 + $0xf8] sm:$0xff] }
 0x155   : > { %830 = vmatprep.mubr.f32.mxu1 %v2189_v25  ;;  %v683_v10 = vadd.f32 %v667_v27, %v644_v32  ;;  %v628_v61 = vadd.f32 %v1904_v34, %v2605_v21  ;;  %v622_v36 = vpop.f32.mrb[15].mxu0  ;;  %v1150_v27 = vld [vmem:[%s2976_s8 + $0xd8] sm:$0xff]  ;;  %v720_v34 = vlaneseq }
 0x156   : > { %v682_v8 = vadd.f32 %v666_v30, %v643_v33  ;;  %v623_v38 = vadd.f32 %v2605_v21, %v622_v36  ;;  %v937_v21 = vld [vmem:[%s2974_s6 + $0x70] sm:$0xff]  ;;  %2004 = vmatpush1.bf16.msra.mxu1 %v2003_v1  ;;  %v2025_v28 = vpack.c.bf16 %v1150_v27, %v1148_v26 }
 0x157   : > { %v646_v9 = vmax.f32 %v628_v61, 0.0  ;;  %v1999_v42 = vpack.c.bf16 %v938_v63, %v937_v21  ;;  %2006 = vmatprep.subr.bf16.mxu1 %v2005_v49  ;;  %v1149_v30 = vld [vmem:[%s2976_s8 + $0xd0] sm:$0xff]  ;;  %v718_v61 = vld [vmem:[%s2973_s5] sm:$0x3] }
 0x158   : > { %831 = vmatmul.mubr.f32.gmra.mrb[12].mxu1 %v676_v2  ;;  %v645_v39 = vmax.f32 %v623_v38, 0.0  ;;  %v1135_v2 = vld [vmem:[%s2976_s8 + $0x60] sm:$0xff]  ;;  %v2027_v32 = vpack.c.bf16 %v1149_v30, %v1147_v29 }
 0x159   : > { %836 = vmatprep.mubr.f32.mxu1 %v2189_v25  ;;  %v685_v40 = vadd.f32 %v669_v35, %v646_v9  ;;  %2000 = vmatpush3.bf16.msra.mxu0 %v1999_v42  ;;  %v2015_v15 = vpack.c.bf16 %v1137_v60, %v1135_v2  ;;  %v2773_v35 = vshrl.u32 %v720_v34, 7 }
 0x15a   : > { %v684_v41 = vadd.f32 %v668_v37, %v645_v39  ;;  %2008 = vmatpush1.bf16.msra.mxu1 %v2007_v53 }
 0x15b   : > { %2010 = vmatprep.subr.bf16.mxu1 %v2009_v54  ;;  %v726_v36 = vsub.s32 1, %v2773_v35 }
 0x15c   : > { %837 = vmatmul.mubr.f32.gmra.mrb[14].mxu1 %v677_v3  ;;  %v1136_v3 = vld [vmem:[%s2976_s8 + $0x68] sm:$0xff] }
 0x15d   : > { %842 = vmatprep.mubr.f32.mxu1 %v2189_v25  ;;  %v2013_v59 = vpack.c.bf16 %v1138_v57, %v1136_v3 }
 0x15e   : > { %2012 = vmatpush1.bf16.msra.mxu1 %v2011_v58 }
 0x15f   : > { %2014 = vmatprep.subr.bf16.mxu1 %v2013_v59 }
 0x160   : > { %843 = vmatmul.mubr.f32.gmra.mrb[16].mxu1 %v678_v4 }
 0x161   : > { %848 = vmatprep.mubr.f32.mxu1 %v2189_v25 }
 0x162   : > { %2016 = vmatpush1.bf16.msra.mxu1 %v2015_v15 }
 0x163   : > { %2018 = vmatprep.subr.bf16.mxu1 %v2017_v16 }
 0x164   : > { %849 = vmatmul.mubr.f32.gmra.mrb[18].mxu1 %v679_v5  ;;  %v1139_v5 = vld [vmem:[%s2976_s8 + $0x80] sm:$0xff] }
 0x165   : > { %854 = vmatprep.mubr.f32.mxu1 %v2189_v25  ;;  %v2019_v4 = vpack.c.bf16 %v1141_v17, %v1139_v5 }
 0x167   : > { %2020 = vmatpush1.bf16.msra.mxu1 %v2019_v4 }
 0x168   : > { %855 = vmatmul.mubr.f32.gmra.mrb[20].mxu1 %v680_v6  ;;  %2022 = vmatprep.subr.bf16.mxu1 %v2021_v22  ;;  %v1152_v6 = vld [vmem:[%s2976_s8 + $0xe8] sm:$0xff] }
 0x169   : > { %860 = vmatprep.mubr.f32.mxu1 %v2189_v25  ;;  %v2029_v33 = vpack.c.bf16 %v1154_v31, %v1152_v6 }
 0x16c   : > { %861 = vmatmul.mubr.f32.gmra.mrb[22].mxu1 %v681_v7  ;;  %v2023_v7 = vpack.c.bf16 %v1145_v24, %v1143_v23 }
 0x16d   : > { %866 = vmatprep.mubr.f32.mxu1 %v2189_v25 }
 0x16e   : > { %2024 = vmatpush1.bf16.msra.mxu1 %v2023_v7 }
 0x16f   : > { %2026 = vmatprep.subr.bf16.mxu1 %v2025_v28 }
 0x170   : > { %867 = vmatmul.mubr.f32.gmra.mrb[24].mxu1 %v682_v8  ;;  %v2786_v8 = vrot.slane %v718_v61, %v726_v36 }
 0x171   : > { %872 = vmatprep.mubr.f32.mxu1 %v2189_v25 }
 0x172   : > { %2028 = vmatpush1.bf16.msra.mxu1 %v2027_v32 }
 0x173   : > { %2030 = vmatprep.subr.bf16.mxu1 %v2029_v33 }
 0x174   : > { %873 = vmatmul.mubr.f32.gmra.mrb[26].mxu1 %v683_v10  ;;  %v722_v10 = vsub.s32 0, %v2773_v35 }
 0x175   : > { %878 = vmatprep.mubr.f32.mxu1 %v2189_v25 }
 0x176   : > { %v2782_v37 = vrot.slane %v718_v61, %v722_v10 }
 0x178   : > { %879 = vmatmul.mubr.f32.gmra.mrb[28].mxu1 %v684_v41 }
 0x179   : > { %884 = vmatprep.mubr.f32.mxu1 %v2189_v25 }
 0x17c   : > { %885 = vmatmul.mubr.f32.gmra.mrb[30].mxu1 %v685_v40 }
 0x17d   : > { %1231 = vmatprep.mubr.f32.mxu1 %v2189_v25 }
 0x213   : > { %v796_v38 = vpop.f32.mrb[0].mxu1 }
 0x214   : > { %v797_v9 = vadd.f32 %v796_v38, %v2782_v37  ;;  %v798_v39 = vpop.f32.mrb[1].mxu1 }
 0x215   : > { %v799_v40 = vadd.f32 %v798_v39, %v2786_v8 }
 0x216   : > { %v891_v12 = vmax.f32 %v797_v9, 0.0 }
 0x217   : > { %v892_v41 = vmax.f32 %v799_v40, 0.0  ;;  %v802_v11 = vpop.f32.mrb[2].mxu1 }
 0x218   : > { %v803_v20 = vadd.f32 %v802_v11, %v2782_v37  ;;  %v804_v21 = vpop.f32.mrb[3].mxu1 }
 0x219   : > { %v805_v63 = vadd.f32 %v804_v21, %v2786_v8  ;;  %1026 = vmatprep.mubr.f32.mxu0 %v892_v41 }
 0x21a   : > { %1027 = vmatmul.mubr.f32.vlgmr.msra.gmra.mrb[16].mxu0 %v891_v12  ;;  %v893_v62 = vmax.f32 %v803_v20, 0.0 }
 0x21b   : > { %v894_v42 = vmax.f32 %v805_v63, 0.0  ;;  %v808_v43 = vpop.f32.mrb[4].mxu1 }
 0x21c   : > { %v809_v44 = vadd.f32 %v808_v43, %v2782_v37  ;;  %v810_v45 = vpop.f32.mrb[5].mxu1 }
 0x21d   : > { %v811_v46 = vadd.f32 %v810_v45, %v2786_v8  ;;  %1031 = vmatprep.mubr.f32.mxu0 %v894_v42 }
 0x21e   : > { %1032 = vmatmul.mubr.f32.gmra.mrb[18].mxu0 %v893_v62  ;;  %v895_v1 = vmax.f32 %v809_v44, 0.0 }
 0x21f   : > { %v896_v47 = vmax.f32 %v811_v46, 0.0  ;;  %v814_v48 = vpop.f32.mrb[6].mxu1 }
 0x220   : > { %v815_v49 = vadd.f32 %v814_v48, %v2782_v37  ;;  %v816_v50 = vpop.f32.mrb[7].mxu1 }
 0x221   : > { %v817_v51 = vadd.f32 %v816_v50, %v2786_v8  ;;  %1036 = vmatprep.mubr.f32.mxu0 %v896_v47 }
 0x222   : > { %1037 = vmatmul.mubr.f32.gmra.mrb[20].mxu0 %v895_v1  ;;  %v897_v53 = vmax.f32 %v815_v49, 0.0 }
 0x223   : > { %v898_v0 = vmax.f32 %v817_v51, 0.0  ;;  %v820_v52 = vpop.f32.mrb[8].mxu1 }
 0x224   : > { %v821_v54 = vadd.f32 %v820_v52, %v2782_v37  ;;  %v822_v55 = vpop.f32.mrb[9].mxu1 }
 0x225   : > { %v823_v56 = vadd.f32 %v822_v55, %v2786_v8  ;;  %1041 = vmatprep.mubr.f32.mxu0 %v898_v0 }
 0x226   : > { %1042 = vmatmul.mubr.f32.gmra.mrb[22].mxu0 %v897_v53  ;;  %v899_v58 = vmax.f32 %v821_v54, 0.0 }
 0x227   : > { %v900_v3 = vmax.f32 %v823_v56, 0.0  ;;  %v826_v57 = vpop.f32.mrb[10].mxu1 }
 0x228   : > { %v827_v59 = vadd.f32 %v826_v57, %v2782_v37  ;;  %v828_v2 = vpop.f32.mrb[11].mxu1 }
 0x229   : > { %v829_v60 = vadd.f32 %v828_v2, %v2786_v8  ;;  %1046 = vmatprep.mubr.f32.mxu0 %v900_v3 }
 0x22a   : > { %1047 = vmatmul.mubr.f32.gmra.mrb[24].mxu0 %v899_v58  ;;  %v901_v15 = vmax.f32 %v827_v59, 0.0 }
 0x22b   : > { %v902_v13 = vmax.f32 %v829_v60, 0.0  ;;  %v832_v14 = vpop.f32.mrb[12].mxu1 }
 0x22c   : > { %v833_v16 = vadd.f32 %v832_v14, %v2782_v37  ;;  %v834_v5 = vpop.f32.mrb[13].mxu1 }
 0x22d   : > { %v835_v17 = vadd.f32 %v834_v5, %v2786_v8  ;;  %1051 = vmatprep.mubr.f32.mxu0 %v902_v13  ;;  %v1151_v5 = vld [vmem:[%s2976_s8 + $0xe0] sm:$0xff] }
 0x22e   : > { %1052 = vmatmul.mubr.f32.gmra.mrb[26].mxu0 %v901_v15  ;;  %v903_v4 = vmax.f32 %v833_v16, 0.0 }
 0x22f   : > { %v904_v18 = vmax.f32 %v835_v17, 0.0  ;;  %v838_v19 = vpop.f32.mrb[14].mxu1  ;;  %v1153_v17 = vld [vmem:[%s2976_s8 + $0xf0] sm:$0xff] }
 0x230   : > { %v839_v22 = vadd.f32 %v838_v19, %v2782_v37  ;;  %v840_v23 = vpop.f32.mrb[15].mxu1  ;;  %v1377_v19 = vld [vmem:[#allocation4 + $0x88] sm:$0xff] }
 0x231   : > { %v841_v24 = vadd.f32 %v840_v23, %v2786_v8  ;;  %1056 = vmatprep.mubr.f32.mxu0 %v904_v18  ;;  %v2031_v18 = vpack.c.bf16 %v1153_v17, %v1151_v5  ;;  %v1378_v23 = vld [vmem:[#allocation4 + $0x90] sm:$0xff] }
 0x232   : > { %1057 = vmatmul.mubr.f32.gmra.mrb[28].mxu0 %v903_v4  ;;  %v905_v7 = vmax.f32 %v839_v22, 0.0  ;;  %v1360_v4 = vld [vmem:[#allocation4] sm:$0xff]  ;;  %v1361_v22 = vld [vmem:[#allocation4 + $0x8] sm:$0xff] }
 0x233   : > { %v906_v26 = vmax.f32 %v841_v24, 0.0  ;;  %v844_v27 = vpop.f32.mrb[16].mxu1  ;;  %2032 = vmatpush1.bf16.msra.mxu1 %v2031_v18  ;;  %v1379_v24 = vld [vmem:[#allocation4 + $0x98] sm:$0xff] }
 0x234   : > { %v845_v28 = vadd.f32 %v844_v27, %v2782_v37  ;;  %v846_v29 = vpop.f32.mrb[17].mxu1  ;;  %v2037_v27 = vpack.c.bf16 %v1379_v24, %v1378_v23 }
 0x235   : > { %v847_v30 = vadd.f32 %v846_v29, %v2786_v8  ;;  %1061 = vmatprep.mubr.f32.mxu0 %v906_v26  ;;  %v2035_v26 = vpack.c.bf16 %v1361_v22, %v1360_v4  ;;  %v1380_v29 = vld [vmem:[#allocation4 + $0xa0] sm:$0xff] }
 0x236   : > { %1062 = vmatmul.mubr.f32.gmra.mrb[30].mxu0 %v905_v7  ;;  %v907_v32 = vmax.f32 %v845_v28, 0.0  ;;  %v1362_v7 = vld [vmem:[#allocation4 + $0x10] sm:$0xff]  ;;  %v1363_v28 = vld [vmem:[#allocation4 + $0x18] sm:$0xff] }
 0x237   : > { %v908_v6 = vmax.f32 %v847_v30, 0.0  ;;  %v850_v31 = vpop.f32.mrb[18].mxu1  ;;  %v1381_v30 = vld [vmem:[#allocation4 + $0xa8] sm:$0xff] }
 0x238   : > { %v851_v33 = vadd.f32 %v850_v31, %v2782_v37  ;;  %v852_v34 = vpop.f32.mrb[19].mxu1  ;;  %v2041_v31 = vpack.c.bf16 %v1381_v30, %v1380_v29 }
 0x239   : > { %v853_v61 = vadd.f32 %v852_v34, %v2786_v8  ;;  %1066 = vmatprep.mubr.f32.mxu0 %v908_v6  ;;  %v2039_v6 = vpack.c.bf16 %v1363_v28, %v1362_v7  ;;  %v1382_v34 = vld [vmem:[#allocation4 + $0xb0] sm:$0xff] }
 0x23a   : > { %1067 = vmatmul.mubr.f32.gmra.mrb[32].mxu0 %v907_v32  ;;  %v909_v39 = vmax.f32 %v851_v33, 0.0  ;;  %v1364_v32 = vld [vmem:[#allocation4 + $0x20] sm:$0xff]  ;;  %v1365_v33 = vld [vmem:[#allocation4 + $0x28] sm:$0xff] }
 0x23b   : > { %v910_v38 = vmax.f32 %v853_v61, 0.0  ;;  %v856_v9 = vpop.f32.mrb[20].mxu1  ;;  %v1383_v61 = vld [vmem:[#allocation4 + $0xb8] sm:$0xff] }
 0x23c   : > { %v857_v40 = vadd.f32 %v856_v9, %v2782_v37  ;;  %v858_v41 = vpop.f32.mrb[21].mxu1  ;;  %v2045_v9 = vpack.c.bf16 %v1383_v61, %v1382_v34 }
 0x23d   : > { %v859_v11 = vadd.f32 %v858_v41, %v2786_v8  ;;  %1071 = vmatprep.mubr.f32.mxu0 %v910_v38  ;;  %v2043_v38 = vpack.c.bf16 %v1365_v33, %v1364_v32  ;;  %v1384_v41 = vld [vmem:[#allocation4 + $0xc0] sm:$0xff] }
 0x23e   : > { %1072 = vmatmul.mubr.f32.gmra.mrb[34].mxu0 %v909_v39  ;;  %v911_v21 = vmax.f32 %v857_v40, 0.0  ;;  %v1366_v39 = vld [vmem:[#allocation4 + $0x30] sm:$0xff]  ;;  %v1367_v40 = vld [vmem:[#allocation4 + $0x38] sm:$0xff] }
 0x23f   : > { %v912_v12 = vmax.f32 %v859_v11, 0.0  ;;  %v862_v20 = vpop.f32.mrb[22].mxu1  ;;  %v1385_v11 = vld [vmem:[#allocation4 + $0xc8] sm:$0xff] }
 0x240   : > { %v863_v63 = vadd.f32 %v862_v20, %v2782_v37  ;;  %v864_v42 = vpop.f32.mrb[23].mxu1  ;;  %v2826_v20 = vpack.c.bf16 %v1385_v11, %v1384_v41 }
 0x241   : > { %v865_v43 = vadd.f32 %v864_v42, %v2786_v8  ;;  %1076 = vmatprep.mubr.f32.mxu0 %v912_v12  ;;  %v2047_v12 = vpack.c.bf16 %v1367_v40, %v1366_v39  ;;  %v1386_v42 = vld [vmem:[#allocation4 + $0xd0] sm:$0xff] }
 0x242   : > { %1077 = vmatmul.mubr.f32.gmra.mrb[36].mxu0 %v911_v21  ;;  %v913_v45 = vmax.f32 %v863_v63, 0.0  ;;  %v1368_v21 = vld [vmem:[#allocation4 + $0x40] sm:$0xff]  ;;  %v1369_v63 = vld [vmem:[#allocation4 + $0x48] sm:$0xff] }
 0x243   : > { %v914_v62 = vmax.f32 %v865_v43, 0.0  ;;  %v868_v44 = vpop.f32.mrb[24].mxu1  ;;  %v1387_v43 = vld [vmem:[#allocation4 + $0xd8] sm:$0xff] }
 0x244   : > { %v869_v46 = vadd.f32 %v868_v44, %v2782_v37  ;;  %v870_v47 = vpop.f32.mrb[25].mxu1  ;;  %v2829_v44 = vpack.c.bf16 %v1387_v43, %v1386_v42 }
 0x245   : > { %v871_v48 = vadd.f32 %v870_v47, %v2786_v8  ;;  %1081 = vmatprep.mubr.f32.mxu0 %v914_v62  ;;  %v2051_v62 = vpack.c.bf16 %v1369_v63, %v1368_v21  ;;  %v1388_v47 = vld [vmem:[#allocation4 + $0xe0] sm:$0xff] }
 0x246   : > { %1082 = vmatmul.mubr.f32.gmra.mrb[38].mxu0 %v913_v45  ;;  %v915_v50 = vmax.f32 %v869_v46, 0.0  ;;  %v1370_v45 = vld [vmem:[#allocation4 + $0x50] sm:$0xff]  ;;  %v1371_v46 = vld [vmem:[#allocation4 + $0x58] sm:$0xff] }
 0x247   : > { %v916_v1 = vmax.f32 %v871_v48, 0.0  ;;  %v874_v49 = vpop.f32.mrb[26].mxu1  ;;  %v1389_v48 = vld [vmem:[#allocation4 + $0xe8] sm:$0xff] }
 0x248   : > { %v875_v51 = vadd.f32 %v874_v49, %v2782_v37  ;;  %v876_v0 = vpop.f32.mrb[27].mxu1  ;;  %v2834_v49 = vpack.c.bf16 %v1389_v48, %v1388_v47 }
 0x249   : > { %v877_v52 = vadd.f32 %v876_v0, %v2786_v8  ;;  %1086 = vmatprep.mubr.f32.mxu0 %v916_v1  ;;  %v2831_v1 = vpack.c.bf16 %v1371_v46, %v1370_v45 }
 0x24a   : > { %1087 = vmatmul.mubr.f32.gmra.mrb[40].mxu0 %v915_v50  ;;  %v917_v55 = vmax.f32 %v875_v51, 0.0  ;;  %v2841_v51 = vld [vmem:[%s2975_s7] ss:$0 sm:$0xff] }
 0x24b   : > { %v918_v53 = vmax.f32 %v877_v52, 0.0  ;;  %v880_v54 = vpop.f32.mrb[28].mxu1 }
 0x24c   : > { %v881_v56 = vadd.f32 %v880_v54, %v2782_v37  ;;  %v882_v3 = vpop.f32.mrb[29].mxu1 }
 0x24d   : > { %v883_v57 = vadd.f32 %v882_v3, %v2786_v8  ;;  %1091 = vmatprep.mubr.f32.mxu0 %v918_v53 }
 0x24e   : > { %1092 = vmatmul.mubr.f32.gmra.mrb[42].mxu0 %v917_v55  ;;  %v919_v2 = vmax.f32 %v881_v56, 0.0 }
 0x24f   : > { %v920_v58 = vmax.f32 %v883_v57, 0.0  ;;  %v886_v59 = vpop.f32.mrb[30].mxu1 }
 0x250   : > { %v887_v60 = vadd.f32 %v886_v59, %v2782_v37  ;;  %v888_v13 = vpop.f32.mrb[31].mxu1  ;;  %v1376_v37 = vld [vmem:[#allocation4 + $0x80] sm:$0xff] }
 0x251   : > { %v889_v14 = vadd.f32 %v888_v13, %v2786_v8  ;;  %1096 = vmatprep.mubr.f32.mxu0 %v920_v58  ;;  %v2033_v8 = vpack.c.bf16 %v1377_v19, %v1376_v37 }
 0x252   : > { %1097 = vmatmul.mubr.f32.gmra.mrb[44].mxu0 %v919_v2  ;;  %v921_v16 = vmax.f32 %v887_v60, 0.0 }
 0x253   : > { %v922_v15 = vmax.f32 %v889_v14, 0.0  ;;  %2034 = vmatprep.subr.bf16.mxu0 %v2033_v8  ;;  %2065 = vmatprep.subr.bf16.mxu1 %v2033_v8 }
 0x254   : > { %2036 = vmatpush3.bf16.msra.mxu0 %v2035_v26 }
 0x255   : > { %1101 = vmatprep.mubr.f32.mxu0 %v922_v15  ;;  %2038 = vmatprep.subr.bf16.mxu0 %v2037_v27 }
 0x256   : > { %1102 = vmatmul.mubr.f32.gmra.mrb[46].mxu0 %v921_v16 }
 0x258   : > { %2040 = vmatpush3.bf16.msra.mxu0 %v2039_v6 }
 0x259   : > { %2042 = vmatprep.subr.bf16.mxu0 %v2041_v31 }
 0x25c   : > { %2044 = vmatpush3.bf16.msra.mxu0 %v2043_v38 }
 0x25d   : > { %2046 = vmatprep.subr.bf16.mxu0 %v2045_v9 }
 0x260   : > { %2048 = vmatpush3.bf16.msra.mxu0 %v2047_v12 }
 0x261   : > { %2050 = vmatprep.subr.bf16.mxu0 %v2826_v20 }
 0x264   : > { %2052 = vmatpush3.bf16.msra.mxu0 %v2051_v62 }
 0x265   : > { %2054 = vmatprep.subr.bf16.mxu0 %v2829_v44 }
 0x268   : > { %2056 = vmatpush3.bf16.msra.mxu0 %v2831_v1 }
 0x269   : > { %2058 = vmatprep.subr.bf16.mxu0 %v2834_v49 }
 0x2ed   : > { %v1721_v50 = vpop.f32.mrb[16].mxu0 }
 0x2ee   : > { %v1722_v0 = vpop.f32.mrb[17].mxu0 }
 0x2ef   : > { %v1723_v52 = vadd.f32 %v1722_v0, %v1721_v50 }
 0x2f1   : > { %v1029_v53 = vadd.f32 %v1723_v52, %v2841_v51  ;;  %v1724_v54 = vpop.f32.mrb[18].mxu0 }
 0x2f2   : > { %v1725_v55 = vpop.f32.mrb[19].mxu0 }
 0x2f3   : > { %v1107_v56 = vmax.f32 %v1029_v53, 0.0  ;;  %v1726_v3 = vadd.f32 %v1725_v55, %v1724_v54 }
 0x2f5   : > { %v1034_v57 = vadd.f32 %v1726_v3, %v2841_v51  ;;  %v1727_v58 = vpop.f32.mrb[20].mxu0  ;;  %1232 = vmatmul.mubr.f32.vlgmr.msra.gmra.mrb[32].mxu1 %v1107_v56 }
 0x2f6   : > { %v1728_v59 = vpop.f32.mrb[21].mxu0  ;;  %1237 = vmatprep.mubr.f32.mxu1 %v2189_v25  ;;  %2073 = vmatpush3.bf16.msra.mxu1 %v2035_v26 }
 0x2f7   : > { %v1108_v2 = vmax.f32 %v1034_v57, 0.0  ;;  %v1729_v60 = vadd.f32 %v1728_v59, %v1727_v58  ;;  %2066 = vmatprep.subr.bf16.mxu1 %v2037_v27 }
 0x2f9   : > { %v1039_v13 = vadd.f32 %v1729_v60, %v2841_v51  ;;  %v1730_v14 = vpop.f32.mrb[22].mxu0  ;;  %1238 = vmatmul.mubr.f32.gmra.mrb[34].mxu1 %v1108_v2 }
 0x2fa   : > { %v1731_v15 = vpop.f32.mrb[23].mxu0  ;;  %1243 = vmatprep.mubr.f32.mxu1 %v2189_v25  ;;  %2074 = vmatpush3.bf16.msra.mxu1 %v2039_v6 }
 0x2fb   : > { %v1109_v16 = vmax.f32 %v1039_v13, 0.0  ;;  %v1732_v5 = vadd.f32 %v1731_v15, %v1730_v14  ;;  %2067 = vmatprep.subr.bf16.mxu1 %v2041_v31 }
 0x2fd   : > { %v1044_v17 = vadd.f32 %v1732_v5, %v2841_v51  ;;  %v1733_v18 = vpop.f32.mrb[24].mxu0  ;;  %1244 = vmatmul.mubr.f32.gmra.mrb[36].mxu1 %v1109_v16 }
 0x2fe   : > { %v1734_v37 = vpop.f32.mrb[25].mxu0  ;;  %1249 = vmatprep.mubr.f32.mxu1 %v2189_v25  ;;  %2075 = vmatpush3.bf16.msra.mxu1 %v2043_v38 }
 0x2ff   : > { %v1110_v19 = vmax.f32 %v1044_v17, 0.0  ;;  %v1735_v4 = vadd.f32 %v1734_v37, %v1733_v18  ;;  %2068 = vmatprep.subr.bf16.mxu1 %v2045_v9 }
 0x301   : > { %v1049_v8 = vadd.f32 %v1735_v4, %v2841_v51  ;;  %v1736_v22 = vpop.f32.mrb[26].mxu0  ;;  %1250 = vmatmul.mubr.f32.gmra.mrb[38].mxu1 %v1110_v19  ;;  %v1372_v19 = vld [vmem:[#allocation4 + $0x60] sm:$0xff]  ;;  %v1373_v4 = vld [vmem:[#allocation4 + $0x68] sm:$0xff] }
 0x302   : > { %v1737_v23 = vpop.f32.mrb[27].mxu0  ;;  %1255 = vmatprep.mubr.f32.mxu1 %v2189_v25  ;;  %2076 = vmatpush3.bf16.msra.mxu1 %v2047_v12 }
 0x303   : > { %v1111_v24 = vmax.f32 %v1049_v8, 0.0  ;;  %v1738_v26 = vadd.f32 %v1737_v23, %v1736_v22  ;;  %2069 = vmatprep.subr.bf16.mxu1 %v2826_v20  ;;  %v2059_v8 = vpack.c.bf16 %v1373_v4, %v1372_v19  ;;  %v1390_v22 = vld [vmem:[#allocation4 + $0xf0] sm:$0xff]  ;;  %v1391_v23 = vld [vmem:[#allocation4 + $0xf8] sm:$0xff] }
 0x305   : > { %v1054_v27 = vadd.f32 %v1738_v26, %v2841_v51  ;;  %v1739_v7 = vpop.f32.mrb[28].mxu0  ;;  %1256 = vmatmul.mubr.f32.gmra.mrb[40].mxu1 %v1111_v24  ;;  %2060 = vmatpush3.bf16.msra.mxu0 %v2059_v8  ;;  %v2061_v24 = vpack.c.bf16 %v1391_v23, %v1390_v22  ;;  %v1374_v26 = vld [vmem:[#allocation4 + $0x70] sm:$0xff] }
 0x306   : > { %v1740_v28 = vpop.f32.mrb[29].mxu0  ;;  %1261 = vmatprep.mubr.f32.mxu1 %v2189_v25  ;;  %2077 = vmatpush3.bf16.msra.mxu1 %v2051_v62 }
 0x307   : > { %v1112_v29 = vmax.f32 %v1054_v27, 0.0  ;;  %v1741_v30 = vadd.f32 %v1740_v28, %v1739_v7  ;;  %2070 = vmatprep.subr.bf16.mxu1 %v2829_v44  ;;  %v1375_v27 = vld [vmem:[#allocation4 + $0x78] sm:$0xff]  ;;  %2062 = vmatprep.subr.bf16.mxu0 %v2061_v24 }
 0x308   : > { %v2063_v7 = vpack.c.bf16 %v1375_v27, %v1374_v26 }
 0x309   : > { %v1059_v6 = vadd.f32 %v1741_v30, %v2841_v51  ;;  %v1742_v31 = vpop.f32.mrb[30].mxu0  ;;  %1262 = vmatmul.mubr.f32.gmra.mrb[42].mxu1 %v1112_v29 }
 0x30a   : > { %v1743_v32 = vpop.f32.mrb[31].mxu0  ;;  %1267 = vmatprep.mubr.f32.mxu1 %v2189_v25  ;;  %2078 = vmatpush3.bf16.msra.mxu1 %v2831_v1 }
 0x30b   : > { %v1113_v33 = vmax.f32 %v1059_v6, 0.0  ;;  %v1744_v34 = vadd.f32 %v1743_v32, %v1742_v31  ;;  %2071 = vmatprep.subr.bf16.mxu1 %v2834_v49  ;;  %2064 = vmatpush3.bf16.msra.mxu0 %v2063_v7 }
 0x30d   : > { %v1064_v61 = vadd.f32 %v1744_v34, %v2841_v51  ;;  %v1745_v38 = vpop.f32.mrb[32].mxu0  ;;  %1268 = vmatmul.mubr.f32.gmra.mrb[44].mxu1 %v1113_v33 }
 0x30e   : > { %v1746_v9 = vpop.f32.mrb[33].mxu0  ;;  %1273 = vmatprep.mubr.f32.mxu1 %v2189_v25  ;;  %2079 = vmatpush3.bf16.msra.mxu1 %v2059_v8 }
 0x30f   : > { %v1114_v39 = vmax.f32 %v1064_v61, 0.0  ;;  %v1747_v40 = vadd.f32 %v1746_v9, %v1745_v38  ;;  %2072 = vmatprep.subr.bf16.mxu1 %v2061_v24 }
 0x311   : > { %v1069_v41 = vadd.f32 %v1747_v40, %v2841_v51  ;;  %v1748_v11 = vpop.f32.mrb[34].mxu0  ;;  %1274 = vmatmul.mubr.f32.gmra.mrb[46].mxu1 %v1114_v39 }
 0x312   : > { %v1749_v12 = vpop.f32.mrb[35].mxu0  ;;  %1279 = vmatprep.mubr.f32.mxu1 %v2189_v25  ;;  %2080 = vmatpush3.bf16.msra.mxu1 %v2063_v7 }
 0x313   : > { %v1115_v20 = vmax.f32 %v1069_v41, 0.0  ;;  %v1750_v21 = vadd.f32 %v1749_v12, %v1748_v11 }
 0x315   : > { %v1074_v63 = vadd.f32 %v1750_v21, %v2841_v51  ;;  %v1751_v42 = vpop.f32.mrb[36].mxu0  ;;  %1280 = vmatmul.mubr.f32.gmra.mrb[48].mxu1 %v1115_v20 }
 0x316   : > { %v1752_v43 = vpop.f32.mrb[37].mxu0  ;;  %1285 = vmatprep.mubr.f32.mxu1 %v2189_v25 }
 0x317   : > { %v1116_v62 = vmax.f32 %v1074_v63, 0.0  ;;  %v1753_v44 = vadd.f32 %v1752_v43, %v1751_v42 }
 0x319   : > { %v1079_v45 = vadd.f32 %v1753_v44, %v2841_v51  ;;  %v1754_v46 = vpop.f32.mrb[38].mxu0  ;;  %1286 = vmatmul.mubr.f32.gmra.mrb[50].mxu1 %v1116_v62 }
 0x31a   : > { %v1755_v47 = vpop.f32.mrb[39].mxu0  ;;  %1291 = vmatprep.mubr.f32.mxu1 %v2189_v25 }
 0x31b   : > { %v1117_v48 = vmax.f32 %v1079_v45, 0.0  ;;  %v1756_v1 = vadd.f32 %v1755_v47, %v1754_v46 }
 0x31d   : > { %v1084_v49 = vadd.f32 %v1756_v1, %v2841_v51  ;;  %v1757_v50 = vpop.f32.mrb[40].mxu0  ;;  %1292 = vmatmul.mubr.f32.gmra.mrb[52].mxu1 %v1117_v48 }
 0x31e   : > { %v1758_v0 = vpop.f32.mrb[41].mxu0  ;;  %1297 = vmatprep.mubr.f32.mxu1 %v2189_v25 }
 0x31f   : > { %v1118_v52 = vmax.f32 %v1084_v49, 0.0  ;;  %v1759_v53 = vadd.f32 %v1758_v0, %v1757_v50 }
 0x321   : > { %v1089_v54 = vadd.f32 %v1759_v53, %v2841_v51  ;;  %v1760_v55 = vpop.f32.mrb[42].mxu0  ;;  %1298 = vmatmul.mubr.f32.gmra.mrb[54].mxu1 %v1118_v52 }
 0x322   : > { %v1761_v56 = vpop.f32.mrb[43].mxu0  ;;  %1303 = vmatprep.mubr.f32.mxu1 %v2189_v25 }
 0x323   : > { %v1119_v3 = vmax.f32 %v1089_v54, 0.0  ;;  %v1762_v57 = vadd.f32 %v1761_v56, %v1760_v55 }
 0x325   : > { %v1094_v58 = vadd.f32 %v1762_v57, %v2841_v51  ;;  %v1763_v59 = vpop.f32.mrb[44].mxu0  ;;  %1304 = vmatmul.mubr.f32.gmra.mrb[56].mxu1 %v1119_v3 }
 0x326   : > { %v1764_v2 = vpop.f32.mrb[45].mxu0  ;;  %1309 = vmatprep.mubr.f32.mxu1 %v2189_v25 }
 0x327   : > { %v1120_v60 = vmax.f32 %v1094_v58, 0.0  ;;  %v1765_v13 = vadd.f32 %v1764_v2, %v1763_v59 }
 0x329   : > { %v1099_v14 = vadd.f32 %v1765_v13, %v2841_v51  ;;  %v1766_v15 = vpop.f32.mrb[46].mxu0  ;;  %1310 = vmatmul.mubr.f32.gmra.mrb[58].mxu1 %v1120_v60 }
 0x32a   : > { %v1767_v16 = vpop.f32.mrb[47].mxu0  ;;  %1315 = vmatprep.mubr.f32.mxu1 %v2189_v25 }
 0x32b   : > { %v1121_v5 = vmax.f32 %v1099_v14, 0.0  ;;  %v1768_v17 = vadd.f32 %v1767_v16, %v1766_v15 }
 0x32d   : > { %v1104_v18 = vadd.f32 %v1768_v17, %v2841_v51  ;;  %1316 = vmatmul.mubr.f32.gmra.mrb[60].mxu1 %v1121_v5 }
 0x32e   : > { %1321 = vmatprep.mubr.f32.mxu1 %v2189_v25  ;;  %v1155_v25 = vld [vmem:[%s2977_s9] sm:$0x3] }
 0x32f   : > { %v1122_v37 = vmax.f32 %v1104_v18, 0.0  ;;  %v2883_v51 = vrot.slane %v1155_v25, %v722_v10  ;;  %v2887_v28 = vrot.slane %v1155_v25, %v726_v36 }
 0x331   : > { %1322 = vmatmul.mubr.f32.gmra.mrb[62].mxu1 %v1122_v37 }
 0x3c8   : > { %v1233_v29 = vpop.f32.mrb[32].mxu1 }
 0x3c9   : > { %v1234_v30 = vadd.f32 %v1233_v29, %v2883_v51  ;;  %v1235_v6 = vpop.f32.mrb[33].mxu1 }
 0x3ca   : > { %v1236_v31 = vadd.f32 %v1235_v6, %v2887_v28 }
 0x3cb   : > { %v1328_v34 = vmax.f32 %v1234_v30, 0.0 }
 0x3cc   : > { %v1329_v32 = vmax.f32 %v1236_v31, 0.0  ;;  %v1239_v33 = vpop.f32.mrb[34].mxu1 }
 0x3cd   : > { %v1240_v61 = vadd.f32 %v1239_v33, %v2883_v51  ;;  %v1241_v38 = vpop.f32.mrb[35].mxu1 }
 0x3ce   : > { %v1242_v9 = vadd.f32 %v1241_v38, %v2887_v28  ;;  %1463 = vmatprep.mubr.f32.mxu0 %v1329_v32 }
 0x3cf   : > { %1464 = vmatmul.mubr.f32.vlgmr.msra.gmra.mrb[48].mxu0 %v1328_v34  ;;  %v1330_v36 = vmax.f32 %v1240_v61, 0.0 }
 0x3d0   : > { %v1331_v10 = vmax.f32 %v1242_v9, 0.0  ;;  %v1245_v35 = vpop.f32.mrb[36].mxu1 }
 0x3d1   : > { %v1246_v39 = vadd.f32 %v1245_v35, %v2883_v51  ;;  %v1247_v40 = vpop.f32.mrb[37].mxu1 }
 0x3d2   : > { %v1248_v41 = vadd.f32 %v1247_v40, %v2887_v28  ;;  %1468 = vmatprep.mubr.f32.mxu0 %v1331_v10 }
 0x3d3   : > { %1469 = vmatmul.mubr.f32.gmra.mrb[50].mxu0 %v1330_v36  ;;  %v1332_v20 = vmax.f32 %v1246_v39, 0.0 }
 0x3d4   : > { %v1333_v11 = vmax.f32 %v1248_v41, 0.0  ;;  %v1251_v12 = vpop.f32.mrb[38].mxu1 }
 0x3d5   : > { %v1252_v21 = vadd.f32 %v1251_v12, %v2883_v51  ;;  %v1253_v63 = vpop.f32.mrb[39].mxu1 }
 0x3d6   : > { %v1254_v42 = vadd.f32 %v1253_v63, %v2887_v28  ;;  %1473 = vmatprep.mubr.f32.mxu0 %v1333_v11 }
 0x3d7   : > { %1474 = vmatmul.mubr.f32.gmra.mrb[52].mxu0 %v1332_v20  ;;  %v1334_v44 = vmax.f32 %v1252_v21, 0.0 }
 0x3d8   : > { %v1335_v43 = vmax.f32 %v1254_v42, 0.0  ;;  %v1257_v62 = vpop.f32.mrb[40].mxu1 }
 0x3d9   : > { %v1258_v45 = vadd.f32 %v1257_v62, %v2883_v51  ;;  %v1259_v46 = vpop.f32.mrb[41].mxu1 }
 0x3da   : > { %v1260_v47 = vadd.f32 %v1259_v46, %v2887_v28  ;;  %1478 = vmatprep.mubr.f32.mxu0 %v1335_v43 }
 0x3db   : > { %1479 = vmatmul.mubr.f32.gmra.mrb[54].mxu0 %v1334_v44  ;;  %v1336_v49 = vmax.f32 %v1258_v45, 0.0 }
 0x3dc   : > { %v1337_v48 = vmax.f32 %v1260_v47, 0.0  ;;  %v1263_v1 = vpop.f32.mrb[42].mxu1 }
 0x3dd   : > { %v1264_v50 = vadd.f32 %v1263_v1, %v2883_v51  ;;  %v1265_v0 = vpop.f32.mrb[43].mxu1 }
 0x3de   : > { %v1266_v52 = vadd.f32 %v1265_v0, %v2887_v28  ;;  %1483 = vmatprep.mubr.f32.mxu0 %v1337_v48 }
 0x3df   : > { %1484 = vmatmul.mubr.f32.gmra.mrb[56].mxu0 %v1336_v49  ;;  %v1338_v55 = vmax.f32 %v1264_v50, 0.0 }
 0x3e0   : > { %v1339_v53 = vmax.f32 %v1266_v52, 0.0  ;;  %v1269_v54 = vpop.f32.mrb[44].mxu1 }
 0x3e1   : > { %v1270_v56 = vadd.f32 %v1269_v54, %v2883_v51  ;;  %v1271_v3 = vpop.f32.mrb[45].mxu1  ;;  %v2924_v54 = vld [vmem:[%s2979_s11] ss:$0 sm:$0xff] }
 0x3e2   : > { %v1272_v57 = vadd.f32 %v1271_v3, %v2887_v28  ;;  %1488 = vmatprep.mubr.f32.mxu0 %v1339_v53 }
 0x3e3   : > { %1489 = vmatmul.mubr.f32.gmra.mrb[58].mxu0 %v1338_v55  ;;  %v1340_v2 = vmax.f32 %v1270_v56, 0.0 }
 0x3e4   : > { %v1341_v58 = vmax.f32 %v1272_v57, 0.0  ;;  %v1275_v59 = vpop.f32.mrb[46].mxu1 }
 0x3e5   : > { %v1276_v60 = vadd.f32 %v1275_v59, %v2883_v51  ;;  %v1277_v13 = vpop.f32.mrb[47].mxu1 }
 0x3e6   : > { %v1278_v14 = vadd.f32 %v1277_v13, %v2887_v28  ;;  %1493 = vmatprep.mubr.f32.mxu0 %v1341_v58 }
 0x3e7   : > { %1494 = vmatmul.mubr.f32.gmra.mrb[60].mxu0 %v1340_v2  ;;  %v1342_v5 = vmax.f32 %v1276_v60, 0.0 }
 0x3e8   : > { %v1343_v15 = vmax.f32 %v1278_v14, 0.0  ;;  %v1281_v16 = vpop.f32.mrb[48].mxu1 }
 0x3e9   : > { %v1282_v17 = vadd.f32 %v1281_v16, %v2883_v51  ;;  %v1283_v18 = vpop.f32.mrb[49].mxu1 }
 0x3ea   : > { %v1284_v37 = vadd.f32 %v1283_v18, %v2887_v28  ;;  %1498 = vmatprep.mubr.f32.mxu0 %v1343_v15 }
 0x3eb   : > { %1499 = vmatmul.mubr.f32.gmra.mrb[62].mxu0 %v1342_v5  ;;  %v1344_v8 = vmax.f32 %v1282_v17, 0.0 }
 0x3ec   : > { %v1345_v19 = vmax.f32 %v1284_v37, 0.0  ;;  %v1287_v4 = vpop.f32.mrb[50].mxu1 }
 0x3ed   : > { %v1288_v22 = vadd.f32 %v1287_v4, %v2883_v51  ;;  %v1289_v23 = vpop.f32.mrb[51].mxu1 }
 0x3ee   : > { %v1290_v24 = vadd.f32 %v1289_v23, %v2887_v28  ;;  %1503 = vmatprep.mubr.f32.mxu0 %v1345_v19 }
 0x3ef   : > { %1504 = vmatmul.mubr.f32.gmra.mrb[64].mxu0 %v1344_v8  ;;  %v1346_v7 = vmax.f32 %v1288_v22, 0.0 }
 0x3f0   : > { %v1347_v26 = vmax.f32 %v1290_v24, 0.0  ;;  %v1293_v27 = vpop.f32.mrb[52].mxu1 }
 0x3f1   : > { %v1294_v25 = vadd.f32 %v1293_v27, %v2883_v51  ;;  %v1295_v29 = vpop.f32.mrb[53].mxu1 }
 0x3f2   : > { %v1296_v30 = vadd.f32 %v1295_v29, %v2887_v28  ;;  %1508 = vmatprep.mubr.f32.mxu0 %v1347_v26 }
 0x3f3   : > { %1509 = vmatmul.mubr.f32.gmra.mrb[66].mxu0 %v1346_v7  ;;  %v1348_v32 = vmax.f32 %v1294_v25, 0.0 }
 0x3f4   : > { %v1349_v6 = vmax.f32 %v1296_v30, 0.0  ;;  %v1299_v31 = vpop.f32.mrb[54].mxu1 }
 0x3f5   : > { %v1300_v33 = vadd.f32 %v1299_v31, %v2883_v51  ;;  %v1301_v34 = vpop.f32.mrb[55].mxu1 }
 0x3f6   : > { %v1302_v61 = vadd.f32 %v1301_v34, %v2887_v28  ;;  %1513 = vmatprep.mubr.f32.mxu0 %v1349_v6 }
 0x3f7   : > { %1514 = vmatmul.mubr.f32.gmra.mrb[68].mxu0 %v1348_v32  ;;  %v1350_v10 = vmax.f32 %v1300_v33, 0.0 }
 0x3f8   : > { %v1351_v38 = vmax.f32 %v1302_v61, 0.0  ;;  %v1305_v9 = vpop.f32.mrb[56].mxu1 }
 0x3f9   : > { %v1306_v35 = vadd.f32 %v1305_v9, %v2883_v51  ;;  %v1307_v36 = vpop.f32.mrb[57].mxu1 }
 0x3fa   : > { %v1308_v39 = vadd.f32 %v1307_v36, %v2887_v28  ;;  %1518 = vmatprep.mubr.f32.mxu0 %v1351_v38 }
 0x3fb   : > { %1519 = vmatmul.mubr.f32.gmra.mrb[70].mxu0 %v1350_v10  ;;  %v1352_v11 = vmax.f32 %v1306_v35, 0.0 }
 0x3fc   : > { %v1353_v40 = vmax.f32 %v1308_v39, 0.0  ;;  %v1311_v41 = vpop.f32.mrb[58].mxu1 }
 0x3fd   : > { %v1312_v12 = vadd.f32 %v1311_v41, %v2883_v51  ;;  %v1313_v20 = vpop.f32.mrb[59].mxu1 }
 0x3fe   : > { %v1314_v21 = vadd.f32 %v1313_v20, %v2887_v28  ;;  %1523 = vmatprep.mubr.f32.mxu1 %v1353_v40 }
 0x3ff   : > { %1524 = vmatmul.mubr.f32.vlgmr.msra.gmra.mrb[64].mxu1 %v1352_v11  ;;  %v1354_v43 = vmax.f32 %v1312_v12, 0.0 }
 0x400   : > { %v1355_v63 = vmax.f32 %v1314_v21, 0.0  ;;  %v1317_v42 = vpop.f32.mrb[60].mxu1 }
 0x401   : > { %v1318_v62 = vadd.f32 %v1317_v42, %v2883_v51  ;;  %v1319_v44 = vpop.f32.mrb[61].mxu1 }
 0x402   : > { %v1320_v45 = vadd.f32 %v1319_v44, %v2887_v28  ;;  %1528 = vmatprep.mubr.f32.mxu1 %v1355_v63 }
 0x403   : > { %1529 = vmatmul.mubr.f32.gmra.mrb[66].mxu1 %v1354_v43  ;;  %v1356_v48 = vmax.f32 %v1318_v62, 0.0 }
 0x404   : > { %v1357_v46 = vmax.f32 %v1320_v45, 0.0  ;;  %v1323_v47 = vpop.f32.mrb[62].mxu1 }
 0x405   : > { %v1324_v1 = vadd.f32 %v1323_v47, %v2883_v51  ;;  %v1325_v49 = vpop.f32.mrb[63].mxu1 }
 0x406   : > { %v1326_v50 = vadd.f32 %v1325_v49, %v2887_v28  ;;  %1533 = vmatprep.mubr.f32.mxu1 %v1357_v46 }
 0x407   : > { %1534 = vmatmul.mubr.f32.gmra.mrb[68].mxu1 %v1356_v48  ;;  %v1358_v52 = vmax.f32 %v1324_v1, 0.0 }
 0x408   : > { %v1359_v0 = vmax.f32 %v1326_v50, 0.0 }
 0x40a   : > { %1538 = vmatprep.mubr.f32.mxu1 %v1359_v0 }
 0x40b   : > { %1539 = vmatmul.mubr.f32.gmra.mrb[70].mxu1 %v1358_v52 }
 0x4a2   : > { %v1801_v53 = vpop.f32.mrb[48].mxu0 }
 0x4a3   : > { %v1802_v55 = vpop.f32.mrb[49].mxu0 }
 0x4a4   : > { %v1803_v56 = vadd.f32 %v1802_v55, %v1801_v53 }
 0x4a6   : > { %v1466_v51 = vadd.f32 %v1803_v56, %v2924_v54  ;;  %v1804_v28 = vpop.f32.mrb[50].mxu0 }
 0x4a7   : > { %v1805_v3 = vpop.f32.mrb[51].mxu0 }
 0x4a8   : > { %1544 = vst [vmem:[%s2931_s20] sm:$0xff] %v1466_v51  ;;  %v1806_v57 = vadd.f32 %v1805_v3, %v1804_v28 }
 0x4aa   : > { %v1471_v58 = vadd.f32 %v1806_v57, %v2924_v54  ;;  %v1807_v59 = vpop.f32.mrb[52].mxu0 }
 0x4ab   : > { %v1808_v2 = vpop.f32.mrb[53].mxu0 }
 0x4ac   : > { %1545 = vst [vmem:[%s2931_s20 + $0x8] sm:$0xff] %v1471_v58  ;;  %v1809_v60 = vadd.f32 %v1808_v2, %v1807_v59 }
 0x4ae   : > { %v1476_v13 = vadd.f32 %v1809_v60, %v2924_v54  ;;  %v1810_v14 = vpop.f32.mrb[54].mxu0 }
 0x4af   : > { %v1811_v15 = vpop.f32.mrb[55].mxu0 }
 0x4b0   : > { %1546 = vst [vmem:[%s2931_s20 + $0x10] sm:$0xff] %v1476_v13  ;;  %v1812_v16 = vadd.f32 %v1811_v15, %v1810_v14 }
 0x4b2   : > { %v1481_v5 = vadd.f32 %v1812_v16, %v2924_v54  ;;  %v1813_v17 = vpop.f32.mrb[56].mxu0 }
 0x4b3   : > { %v1814_v18 = vpop.f32.mrb[57].mxu0 }
 0x4b4   : > { %1547 = vst [vmem:[%s2931_s20 + $0x18] sm:$0xff] %v1481_v5  ;;  %v1815_v37 = vadd.f32 %v1814_v18, %v1813_v17 }
 0x4b6   : > { %v1486_v19 = vadd.f32 %v1815_v37, %v2924_v54  ;;  %v1816_v4 = vpop.f32.mrb[58].mxu0 }
 0x4b7   : > { %v1817_v8 = vpop.f32.mrb[59].mxu0 }
 0x4b8   : > { %1548 = vst [vmem:[%s2931_s20 + $0x20] sm:$0xff] %v1486_v19  ;;  %v1818_v22 = vadd.f32 %v1817_v8, %v1816_v4 }
 0x4ba   : > { %v1491_v23 = vadd.f32 %v1818_v22, %v2924_v54  ;;  %v1819_v24 = vpop.f32.mrb[60].mxu0 }
 0x4bb   : > { %v1820_v26 = vpop.f32.mrb[61].mxu0 }
 0x4bc   : > { %1549 = vst [vmem:[%s2931_s20 + $0x28] sm:$0xff] %v1491_v23  ;;  %v1821_v27 = vadd.f32 %v1820_v26, %v1819_v24 }
 0x4be   : > { %v1496_v7 = vadd.f32 %v1821_v27, %v2924_v54  ;;  %v1822_v25 = vpop.f32.mrb[62].mxu0 }
 0x4bf   : > { %v1823_v29 = vpop.f32.mrb[63].mxu0 }
 0x4c0   : > { %1550 = vst [vmem:[%s2931_s20 + $0x30] sm:$0xff] %v1496_v7  ;;  %v1824_v30 = vadd.f32 %v1823_v29, %v1822_v25 }
 0x4c2   : > { %v1501_v6 = vadd.f32 %v1824_v30, %v2924_v54  ;;  %v1825_v31 = vpop.f32.mrb[64].mxu0 }
 0x4c3   : > { %v1826_v32 = vpop.f32.mrb[65].mxu0 }
 0x4c4   : > { %1551 = vst [vmem:[%s2931_s20 + $0x38] sm:$0xff] %v1501_v6  ;;  %v1827_v33 = vadd.f32 %v1826_v32, %v1825_v31 }
 0x4c6   : > { %v1506_v34 = vadd.f32 %v1827_v33, %v2924_v54  ;;  %v1828_v61 = vpop.f32.mrb[66].mxu0 }
 0x4c7   : > { %v1829_v38 = vpop.f32.mrb[67].mxu0 }
 0x4c8   : > { %1552 = vst [vmem:[%s2931_s20 + $0x40] sm:$0xff] %v1506_v34  ;;  %v1830_v9 = vadd.f32 %v1829_v38, %v1828_v61 }
 0x4ca   : > { %v1511_v10 = vadd.f32 %v1830_v9, %v2924_v54  ;;  %v1831_v35 = vpop.f32.mrb[68].mxu0 }
 0x4cb   : > { %v1832_v36 = vpop.f32.mrb[69].mxu0 }
 0x4cc   : > { %1553 = vst [vmem:[%s2931_s20 + $0x48] sm:$0xff] %v1511_v10  ;;  %v1833_v39 = vadd.f32 %v1832_v36, %v1831_v35 }
 0x4ce   : > { %v1516_v40 = vadd.f32 %v1833_v39, %v2924_v54  ;;  %v1834_v41 = vpop.f32.mrb[70].mxu0 }
 0x4cf   : > { %v1835_v11 = vpop.f32.mrb[71].mxu0 }
 0x4d0   : > { %1554 = vst [vmem:[%s2931_s20 + $0x50] sm:$0xff] %v1516_v40  ;;  %v1836_v12 = vadd.f32 %v1835_v11, %v1834_v41 }
 0x4d2   : > { %v1521_v20 = vadd.f32 %v1836_v12, %v2924_v54  ;;  %v1837_v21 = vpop.f32.mrb[64].mxu1 }
 0x4d3   : > { %v1838_v63 = vpop.f32.mrb[65].mxu1 }
 0x4d4   : > { %1555 = vst [vmem:[%s2931_s20 + $0x58] sm:$0xff] %v1521_v20  ;;  %v1839_v42 = vadd.f32 %v1838_v63, %v1837_v21 }
 0x4d6   : > { %v1526_v43 = vadd.f32 %v1839_v42, %v2924_v54  ;;  %v1840_v62 = vpop.f32.mrb[66].mxu1 }
 0x4d7   : > { %v1841_v44 = vpop.f32.mrb[67].mxu1 }
 0x4d8   : > { %1556 = vst [vmem:[%s2931_s20 + $0x60] sm:$0xff] %v1526_v43  ;;  %v1842_v45 = vadd.f32 %v1841_v44, %v1840_v62 }
 0x4da   : > { %v1531_v46 = vadd.f32 %v1842_v45, %v2924_v54  ;;  %v1843_v47 = vpop.f32.mrb[68].mxu1 }
 0x4db   : > { %v1844_v48 = vpop.f32.mrb[69].mxu1 }
 0x4dc   : > { %1557 = vst [vmem:[%s2931_s20 + $0x68] sm:$0xff] %v1531_v46  ;;  %v1845_v1 = vadd.f32 %v1844_v48, %v1843_v47 }
 0x4de   : > { %v1536_v49 = vadd.f32 %v1845_v1, %v2924_v54  ;;  %v1846_v50 = vpop.f32.mrb[70].mxu1 }
 0x4df   : > { %v1847_v0 = vpop.f32.mrb[71].mxu1 }
 0x4e0   : > { %1558 = vst [vmem:[%s2931_s20 + $0x70] sm:$0xff] %v1536_v49  ;;  %v1848_v52 = vadd.f32 %v1847_v0, %v1846_v50 }
 0x4e2   : > { %v1541_v53 = vadd.f32 %v1848_v52, %v2924_v54 }
 0x4e4   : > { %1559 = vst [vmem:[%s2931_s20 + $0x78] sm:$0xff] %v1541_v53 }
 0x4e5 PF: > { %s24_s21 = sadd.s32 1, %s2183_s21  }
 0x4e6   : > { %p21_p5 = scmp.ge.s32.totalorder %s24_s21, 4  }
 0x4e8   :  { %23 = sbr.rel (!%p21_p5) target bundleno = 2 (0x2), region = 107 }
 0x4ef   :  { %1582 = vsyncpa [#allocation3], 1 }
 0x4f0   :  { %1584 = vsyncpa [#allocation3 + $0x1], 1 }
 0x4f1   :  { %1585 = vsyncpa [#allocation5], 1 }

</bundles_post_ra>
